<compile_context>
chip_gen: v5e
topology: v5e:2x2
jax: 0.10.0
libtpu: 0.0.40
codegen_flags: <defaults>
</compile_context>

<pallas_src>
import functools

import jax
import jax.numpy as jnp
from jax import lax
from jax.experimental import pallas as pl
from jax.experimental.pallas import tpu as pltpu


def _round_up(x, m):
    return (x + m - 1) // m * m


def _cdiv(a, b):
    return (a + b - 1) // b


def _sigmoid1(x):
    # sigmoid(x) == 0.5 * tanh(0.5 * x) + 0.5 : a single EUP push (tanh)
    # instead of exp + reciprocal; scale/add go to the VPU.
    return 0.5 * jnp.tanh(0.5 * x) + 0.5


def _lstm_block_kernel(gx_ref, h0_ref, c0_ref, wh_ref,
                       out_ref, hT_ref, cT_ref,
                       h_sc, c_sc, *, t_blk, h_pad, reverse, k_final):
    """Process one block of t_blk timesteps.

    h/c are carried in registers within the block and in VMEM scratch across
    blocks (the single grid axis is the sequential recurrence).
    """
    j = pl.program_id(0)
    last_j = pl.num_programs(0) - 1

    # Load the initial hidden/cell state on the first grid step only.
    @pl.when(j == 0)
    def _():
        h_sc[...] = h0_ref[...].astype(jnp.float32)
        c_sc[...] = c0_ref[...].astype(jnp.float32)

    # Register carries for the whole block (1 vreg each at B_pad=8, H_pad=128).
    h = h_sc[...]
    c = c_sc[...]

    # Fully unrolled recurrence over the block (t_blk is a small static int).
    for k in range(t_blk):
        lt = t_blk - 1 - k if reverse else k      # static local time index
        h_lo = h.astype(wh_ref.dtype)

        # Per-gate dots against 128-aligned Wh slabs, consumed immediately.
        def gate_pre(g):
            sl = slice(g * h_pad, (g + 1) * h_pad)
            return gx_ref[lt, :, sl].astype(jnp.float32) + jnp.dot(
                h_lo, wh_ref[:, sl], preferred_element_type=jnp.float32)

        i_g = _sigmoid1(gate_pre(0))
        f_g = _sigmoid1(gate_pre(1))
        g_g = jnp.tanh(gate_pre(2))
        o_g = _sigmoid1(gate_pre(3))

        c = f_g * c + i_g * g_g
        h = o_g * jnp.tanh(c)
        out_ref[lt] = h.astype(out_ref.dtype)

        # Final (H, C) come from the last *real* timestep; any time padding is
        # processed strictly after it, so it never contaminates the results.
        if k == k_final:
            @pl.when(j == last_j)
            def _(h_fin=h, c_fin=c):
                hT_ref[...] = h_fin.astype(hT_ref.dtype)
                cT_ref[...] = c_fin.astype(cT_ref.dtype)

    # Cross-block carry: one scratch write per block (not per step).
    h_sc[...] = h
    c_sc[...] = c


def _vmem_footprint(b_pad, h_pad, gx_item, out_item, wh_item):
    """Bytes of VMEM the pipeline needs: fixed part + per-timestep part."""
    fixed = 2 * (h_pad * 4 * h_pad) * wh_item        # Wh (double-buffered)
    fixed += 2 * 2 * (b_pad * h_pad) * 4             # h0 / c0 input blocks
    fixed += 2 * (b_pad * h_pad) * 4                 # f32 carry scratch
    fixed += 2 * 2 * (b_pad * h_pad) * out_item      # hT / cT output blocks
    per_step = 2 * b_pad * (4 * h_pad * gx_item + h_pad * out_item)
    return fixed, per_step


def lstm_sublayer_forward(input_seq, hidden_state, wx, wh, b, direction=1,
                          max_t_blk=32, compute_dtype=jnp.float32,
                          vmem_budget_bytes=48 * 1024 * 1024):
    """Pallas equivalent of LSTMSubLayer.forward.

    input_seq: (B, S, D); hidden_state: ((B, H), (B, H)).
    wx: (D, 4H), wh: (H, 4H), b: (4H,), gate order [i, f, g, o].
    compute_dtype controls the storage dtype of Wh / gates_x (f32 or bf16);
    gate math and carries are always f32.
    Returns (outputs (B, S, H), (H_final, C_final)).
    """
    h0, c0 = hidden_state
    B, S, D = input_seq.shape
    Hd = h0.shape[1]
    assert wx.shape == (D, 4 * Hd) and wh.shape == (Hd, 4 * Hd)
    out_dtype = input_seq.dtype
    reverse = (direction != 1)

    # ---- lane/sublane-dense padded layout (zeros => padded h/c stay zero) ---
    H_pad = _round_up(Hd, 128)
    B_pad = _round_up(B, 8)

    wx_p = jnp.pad(wx.reshape(D, 4, Hd),
                   ((0, 0), (0, 0), (0, H_pad - Hd))).reshape(D, 4 * H_pad)
    wh_p = jnp.pad(wh.reshape(Hd, 4, Hd),
                   ((0, H_pad - Hd), (0, 0), (0, H_pad - Hd))
                   ).reshape(H_pad, 4 * H_pad).astype(compute_dtype)
    b_p = jnp.pad(b.reshape(4, Hd),
                  ((0, 0), (0, H_pad - Hd))).reshape(4 * H_pad)

    h0_p = jnp.pad(h0, ((0, B_pad - B), (0, H_pad - Hd))).astype(jnp.float32)
    c0_p = jnp.pad(c0, ((0, B_pad - B), (0, H_pad - Hd))).astype(jnp.float32)

    # ---- time-block size from a VMEM budget (v7x: 64 MiB physical) ----------
    gx_item = jnp.dtype(compute_dtype).itemsize
    out_item = jnp.dtype(out_dtype).itemsize
    wh_item = jnp.dtype(compute_dtype).itemsize
    fixed, per_step = _vmem_footprint(B_pad, H_pad, gx_item, out_item, wh_item)
    avail = max(vmem_budget_bytes - fixed, per_step)
    t_blk = max(1, min(max_t_blk, S, avail // per_step))
    nb = _cdiv(S, t_blk)
    t_blk = _cdiv(S, nb)                 # rebalance: padding always < t_blk
    S_pad = nb * t_blk
    pad_t = S_pad - S
    # End-pad forward, FRONT-pad reverse, so padded steps are processed after
    # the last real step in either direction.
    pad_front = pad_t if reverse else 0
    pad_back = 0 if reverse else pad_t

    # ---- hoisted input projection on the UNPADDED batch (one big GEMM) ------
    gx = (input_seq.reshape(B * S, D).astype(jnp.float32) @ wx_p
          + b_p[None, :])                                    # (B*S, 4*H_pad)
    gx = jnp.transpose(gx.reshape(B, S, 4 * H_pad), (1, 0, 2))   # (S,B,4H)
    gx = jnp.pad(gx, ((pad_front, pad_back), (0, B_pad - B), (0, 0)))
    gx = gx.astype(compute_dtype)        # streamed operand (bf16 halves HBM BW)

    if reverse:
        # Consume data blocks back-to-front, walk each block backwards;
        # writing H at the consumed time index reproduces outputs.reverse().
        blk_map = lambda j: (nb - 1 - j, 0, 0)
        k_final = t_blk - 1 - pad_front          # step that consumes x[0]
    else:
        blk_map = lambda j: (j, 0, 0)
        k_final = (S - 1) - (nb - 1) * t_blk     # step that consumes x[S-1]
    const2 = lambda j: (0, 0)

    vmem_limit = int(min(100 << 20,
                         max(32 << 20, fixed + t_blk * per_step + (4 << 20))))

    kernel = functools.partial(_lstm_block_kernel, t_blk=t_blk, h_pad=H_pad,
                               reverse=reverse, k_final=k_final)

    out_t, hT, cT = pl.pallas_call(
        kernel,
        out_shape=(
            jax.ShapeDtypeStruct((S_pad, B_pad, H_pad), out_dtype),
            jax.ShapeDtypeStruct((B_pad, H_pad), out_dtype),
            jax.ShapeDtypeStruct((B_pad, H_pad), out_dtype),
        ),
        grid_spec=pltpu.PrefetchScalarGridSpec(
            num_scalar_prefetch=0,
            grid=(nb,),
            in_specs=[
                pl.BlockSpec((t_blk, B_pad, 4 * H_pad), blk_map),  # gates_x blk
                pl.BlockSpec((B_pad, H_pad), const2),              # h0
                pl.BlockSpec((B_pad, H_pad), const2),              # c0
                pl.BlockSpec((H_pad, 4 * H_pad), const2),          # Wh
            ],
            out_specs=[
                pl.BlockSpec((t_blk, B_pad, H_pad), blk_map),      # per-step H
                pl.BlockSpec((B_pad, H_pad), const2),              # final H
                pl.BlockSpec((B_pad, H_pad), const2),              # final C
            ],
            scratch_shapes=[
                pltpu.VMEM((B_pad, H_pad), jnp.float32),           # H carry
                pltpu.VMEM((B_pad, H_pad), jnp.float32),           # C carry
            ],
        ),
        compiler_params=pltpu.CompilerParams(
            dimension_semantics=("arbitrary",),                    # recurrence
            vmem_limit_bytes=vmem_limit),
    )(gx, h0_p, c0_p, wh_p)

    outputs = jnp.transpose(out_t[pad_front:pad_front + S],
                            (1, 0, 2))[:B, :, :Hd]                 # (B, S, H)
    return outputs, (hT[:B, :Hd], cT[:B, :Hd])


def lstm_sublayer_reference(input_seq, hidden_state, wx, wh, b, direction=1):
    """Pure-JAX reference (mirrors the PyTorch loop) for verification."""
    h0, c0 = hidden_state
    x_t = jnp.transpose(input_seq, (1, 0, 2)).astype(jnp.float32)
    if direction == -1:
        x_t = x_t[::-1]
    Hd = h0.shape[1]

    def step(carry, x):
        h, c = carry
        gates = x @ wx + h @ wh + b[None, :]
        i_g = jax.nn.sigmoid(gates[:, 0 * Hd:1 * Hd])
        f_g = jax.nn.sigmoid(gates[:, 1 * Hd:2 * Hd])
        g_g = jnp.tanh(gates[:, 2 * Hd:3 * Hd])
        o_g = jax.nn.sigmoid(gates[:, 3 * Hd:4 * Hd])
        c_new = f_g * c + i_g * g_g
        h_new = o_g * jnp.tanh(c_new)
        return (h_new, c_new), h_new

    (hT, cT), outs = lax.scan(step, (h0.astype(jnp.float32),
                                     c0.astype(jnp.float32)), x_t)
    if direction == -1:
        outs = outs[::-1]
    return jnp.transpose(outs, (1, 0, 2)), (hT, cT)


if __name__ == "__main__":
    ok = True
    # (batch, seq, input_size, hidden_size, max_t_blk)
    configs = [
        (2, 8, 16, 32, 32),   # S divides the time block: no time padding
        (3, 7, 16, 32, 4),    # prime S, multi-block: exercises time padding
    ]
    for cfg_id, (batch_size, seq_len, input_size, hidden_size, mtb) in \
            enumerate(configs):
        key = jax.random.fold_in(jax.random.PRNGKey(0), cfg_id)
        k_x, k_wi, k_wf, k_wg, k_wo, k_b = jax.random.split(key, 6)

        x = jax.random.normal(k_x, (batch_size, seq_len, input_size),
                              jnp.float32)
        h0 = jnp.zeros((batch_size, hidden_size), jnp.float32)   # init_hidden
        c0 = jnp.zeros((batch_size, hidden_size), jnp.float32)

        # PyTorch nn.Linear convention: weight (hidden, input+hidden),
        # bias (hidden,), one Linear per gate in order [i, f, g, o].
        fan_in = input_size + hidden_size
        bound = 1.0 / (fan_in ** 0.5)
        gate_keys = [k_wi, k_wf, k_wg, k_wo]
        Ws = [jax.random.uniform(k, (hidden_size, fan_in), jnp.float32,
                                 -bound, bound) for k in gate_keys]
        bs = [jax.random.uniform(jax.random.fold_in(k_b, i), (hidden_size,),
                                 jnp.float32, -bound, bound) for i in range(4)]

        # Repack into the kernel layout: Wx (D, 4H), Wh (H, 4H), b (4H,).
        wx = jnp.concatenate([W[:, :input_size].T for W in Ws], axis=1)
        wh = jnp.concatenate([W[:, input_size:].T for W in Ws], axis=1)
        b = jnp.concatenate(bs, axis=0)

        for direction in (1, -1):
            out_r, (hT_r, cT_r) = lstm_sublayer_reference(
                x, (h0, c0), wx, wh, b, direction=direction)

            # f32 path: matches the PyTorch module's numerics.
            out, (hT, cT) = lstm_sublayer_forward(
                x, (h0, c0), wx, wh, b, direction=direction, max_t_blk=mtb)
            jax.block_until_ready((out, hT, cT))
            ok &= bool(jnp.allclose(out, out_r, atol=1e-4, rtol=1e-4))
            ok &= bool(jnp.allclose(hT, hT_r, atol=1e-4, rtol=1e-4))
            ok &= bool(jnp.allclose(cT, cT_r, atol=1e-4, rtol=1e-4))

            # bf16 storage for Wh / gates_x (perf trade-off) -> loose tolerance.
            out_b, (hT_b, cT_b) = lstm_sublayer_forward(
                x, (h0, c0), wx, wh, b, direction=direction, max_t_blk=mtb,
                compute_dtype=jnp.bfloat16)
            jax.block_until_ready((out_b, hT_b, cT_b))
            ok &= bool(jnp.allclose(out_b, out_r, atol=1e-1, rtol=1e-1))
            ok &= bool(jnp.allclose(hT_b, hT_r, atol=1e-1, rtol=1e-1))
            ok &= bool(jnp.allclose(cT_b, cT_r, atol=1e-1, rtol=1e-1))

    print("KERNEL_OK" if ok else "KERNEL_MISMATCH")
</pallas_src>

<mosaic_0001>
module attributes {stable_mosaic.version = 11 : i64} {
  func.func @_lstm_block_kernel(%arg0: i32, %arg1: memref<8x8x512xf32, #tpu.memory_space<vmem>>, %arg2: memref<8x128xf32, #tpu.memory_space<vmem>>, %arg3: memref<8x128xf32, #tpu.memory_space<vmem>>, %arg4: memref<128x512xf32, #tpu.memory_space<vmem>>, %arg5: memref<8x8x128xf32, #tpu.memory_space<vmem>>, %arg6: memref<8x128xf32, #tpu.memory_space<vmem>>, %arg7: memref<8x128xf32, #tpu.memory_space<vmem>>, %arg8: memref<8x128xf32, #tpu.memory_space<vmem>>, %arg9: memref<8x128xf32, #tpu.memory_space<vmem>>) attributes {dimension_semantics = [#tpu.dimension_semantics<arbitrary>], iteration_bounds = array<i64: 1>, scalar_prefetch = 0 : i64, scratch_operands = 2 : i64, tpu.core_type = #tpu.core_type<tc>, window_params = [{transform_indices = @transform_0, window_bounds = array<i64: 8, 8, 512>}, {pipeline_mode = #tpu.pipeline_mode<synchronous>, transform_indices = @transform_1, window_bounds = array<i64: 8, 128>}, {pipeline_mode = #tpu.pipeline_mode<synchronous>, transform_indices = @transform_2, window_bounds = array<i64: 8, 128>}, {pipeline_mode = #tpu.pipeline_mode<synchronous>, transform_indices = @transform_3, window_bounds = array<i64: 128, 512>}, {transform_indices = @transform_4, window_bounds = array<i64: 8, 8, 128>}, {pipeline_mode = #tpu.pipeline_mode<synchronous>, transform_indices = @transform_5, window_bounds = array<i64: 8, 128>}, {pipeline_mode = #tpu.pipeline_mode<synchronous>, transform_indices = @transform_6, window_bounds = array<i64: 8, 128>}]} {
    %c0_i32 = arith.constant 0 : i32
    %0 = arith.cmpi eq, %arg0, %c0_i32 : i32
    %1 = arith.extui %0 : i1 to i32
    %c0_i32_0 = arith.constant 0 : i32
    %2 = arith.cmpi ne, %1, %c0_i32_0 : i32
    scf.if %2 {
      %c0_287 = arith.constant 0 : index
      %c0_288 = arith.constant 0 : index
      %410 = vector.load %arg2[%c0_287, %c0_288] : memref<8x128xf32, #tpu.memory_space<vmem>>, vector<8x128xf32>
      %c0_289 = arith.constant 0 : index
      %c0_290 = arith.constant 0 : index
      %411 = vector.load %arg8[%c0_289, %c0_290] : memref<8x128xf32, #tpu.memory_space<vmem>>, vector<8x128xf32>
      tpu.vector_store %arg8[%c0_289, %c0_290], %410 {strides = array<i32>} : memref<8x128xf32, #tpu.memory_space<vmem>>, vector<8x128xf32>,
      %c0_291 = arith.constant 0 : index
      %c0_292 = arith.constant 0 : index
      %412 = vector.load %arg3[%c0_291, %c0_292] : memref<8x128xf32, #tpu.memory_space<vmem>>, vector<8x128xf32>
      %c0_293 = arith.constant 0 : index
      %c0_294 = arith.constant 0 : index
      %413 = vector.load %arg9[%c0_293, %c0_294] : memref<8x128xf32, #tpu.memory_space<vmem>>, vector<8x128xf32>
      tpu.vector_store %arg9[%c0_293, %c0_294], %412 {strides = array<i32>} : memref<8x128xf32, #tpu.memory_space<vmem>>, vector<8x128xf32>,
    } else {
    }
    %c0 = arith.constant 0 : index
    %c0_1 = arith.constant 0 : index
    %3 = vector.load %arg8[%c0, %c0_1] : memref<8x128xf32, #tpu.memory_space<vmem>>, vector<8x128xf32>
    %c0_2 = arith.constant 0 : index
    %c0_3 = arith.constant 0 : index
    %4 = vector.load %arg9[%c0_2, %c0_3] : memref<8x128xf32, #tpu.memory_space<vmem>>, vector<8x128xf32>
    %c0_4 = arith.constant 0 : index
    %c0_5 = arith.constant 0 : index
    %c0_6 = arith.constant 0 : index
    %5 = vector.load %arg1[%c0_4, %c0_5, %c0_6] : memref<8x8x512xf32, #tpu.memory_space<vmem>>, vector<1x8x128xf32>
    %6 = vector.shape_cast %5 : vector<1x8x128xf32> to vector<8x128xf32>
    %c0_7 = arith.constant 0 : index
    %c0_8 = arith.constant 0 : index
    %7 = vector.load %arg4[%c0_7, %c0_8] : memref<128x512xf32, #tpu.memory_space<vmem>>, vector<128x128xf32>
    %cst = arith.constant dense<0.000000e+00> : vector<8x128xf32>
    %8 = tpu.matmul %3, %7, %cst {dimension_numbers = #tpu.dot_dimension_numbers<[1], [0], [0], [1], [0, 0, 1, 1], [], []>} : vector<8x128xf32>, vector<128x128xf32>, vector<8x128xf32> -> vector<8x128xf32>
    %9 = arith.addf %6, %8 : vector<8x128xf32>
    %cst_9 = arith.constant 5.000000e-01 : f32
    %10 = vector.broadcast %cst_9 : f32 to vector<8x128xf32>
    %11 = arith.mulf %10, %9 : vector<8x128xf32>
    %12 = math.tanh %11 : vector<8x128xf32>
    %cst_10 = arith.constant 5.000000e-01 : f32
    %13 = vector.broadcast %cst_10 : f32 to vector<8x128xf32>
    %14 = arith.mulf %13, %12 : vector<8x128xf32>
    %cst_11 = arith.constant 5.000000e-01 : f32
    %15 = vector.broadcast %cst_11 : f32 to vector<8x128xf32>
    %16 = arith.addf %14, %15 : vector<8x128xf32>
    %c0_12 = arith.constant 0 : index
    %c0_13 = arith.constant 0 : index
    %c128 = arith.constant 128 : index
    %17 = vector.load %arg1[%c0_12, %c0_13, %c128] : memref<8x8x512xf32, #tpu.memory_space<vmem>>, vector<1x8x128xf32>
    %18 = vector.shape_cast %17 : vector<1x8x128xf32> to vector<8x128xf32>
    %c0_14 = arith.constant 0 : index
    %c128_15 = arith.constant 128 : index
    %19 = vector.load %arg4[%c0_14, %c128_15] : memref<128x512xf32, #tpu.memory_space<vmem>>, vector<128x128xf32>
    %cst_16 = arith.constant dense<0.000000e+00> : vector<8x128xf32>
    %20 = tpu.matmul %3, %19, %cst_16 {dimension_numbers = #tpu.dot_dimension_numbers<[1], [0], [0], [1], [0, 0, 1, 1], [], []>} : vector<8x128xf32>, vector<128x128xf32>, vector<8x128xf32> -> vector<8x128xf32>
    %21 = arith.addf %18, %20 : vector<8x128xf32>
    %cst_17 = arith.constant 5.000000e-01 : f32
    %22 = vector.broadcast %cst_17 : f32 to vector<8x128xf32>
    %23 = arith.mulf %22, %21 : vector<8x128xf32>
    %24 = math.tanh %23 : vector<8x128xf32>
    %cst_18 = arith.constant 5.000000e-01 : f32
    %25 = vector.broadcast %cst_18 : f32 to vector<8x128xf32>
    %26 = arith.mulf %25, %24 : vector<8x128xf32>
    %cst_19 = arith.constant 5.000000e-01 : f32
    %27 = vector.broadcast %cst_19 : f32 to vector<8x128xf32>
    %28 = arith.addf %26, %27 : vector<8x128xf32>
    %c0_20 = arith.constant 0 : index
    %c0_21 = arith.constant 0 : index
    %c256 = arith.constant 256 : index
    %29 = vector.load %arg1[%c0_20, %c0_21, %c256] : memref<8x8x512xf32, #tpu.memory_space<vmem>>, vector<1x8x128xf32>
    %30 = vector.shape_cast %29 : vector<1x8x128xf32> to vector<8x128xf32>
    %c0_22 = arith.constant 0 : index
    %c256_23 = arith.constant 256 : index
    %31 = vector.load %arg4[%c0_22, %c256_23] : memref<128x512xf32, #tpu.memory_space<vmem>>, vector<128x128xf32>
    %cst_24 = arith.constant dense<0.000000e+00> : vector<8x128xf32>
    %32 = tpu.matmul %3, %31, %cst_24 {dimension_numbers = #tpu.dot_dimension_numbers<[1], [0], [0], [1], [0, 0, 1, 1], [], []>} : vector<8x128xf32>, vector<128x128xf32>, vector<8x128xf32> -> vector<8x128xf32>
    %33 = arith.addf %30, %32 : vector<8x128xf32>
    %34 = math.tanh %33 : vector<8x128xf32>
    %c0_25 = arith.constant 0 : index
    %c0_26 = arith.constant 0 : index
    %c384 = arith.constant 384 : index
    %35 = vector.load %arg1[%c0_25, %c0_26, %c384] : memref<8x8x512xf32, #tpu.memory_space<vmem>>, vector<1x8x128xf32>
    %36 = vector.shape_cast %35 : vector<1x8x128xf32> to vector<8x128xf32>
    %c0_27 = arith.constant 0 : index
    %c384_28 = arith.constant 384 : index
    %37 = vector.load %arg4[%c0_27, %c384_28] : memref<128x512xf32, #tpu.memory_space<vmem>>, vector<128x128xf32>
    %cst_29 = arith.constant dense<0.000000e+00> : vector<8x128xf32>
    %38 = tpu.matmul %3, %37, %cst_29 {dimension_numbers = #tpu.dot_dimension_numbers<[1], [0], [0], [1], [0, 0, 1, 1], [], []>} : vector<8x128xf32>, vector<128x128xf32>, vector<8x128xf32> -> vector<8x128xf32>
    %39 = arith.addf %36, %38 : vector<8x128xf32>
    %cst_30 = arith.constant 5.000000e-01 : f32
    %40 = vector.broadcast %cst_30 : f32 to vector<8x128xf32>
    %41 = arith.mulf %40, %39 : vector<8x128xf32>
    %42 = math.tanh %41 : vector<8x128xf32>
    %cst_31 = arith.constant 5.000000e-01 : f32
    %43 = vector.broadcast %cst_31 : f32 to vector<8x128xf32>
    %44 = arith.mulf %43, %42 : vector<8x128xf32>
    %cst_32 = arith.constant 5.000000e-01 : f32
    %45 = vector.broadcast %cst_32 : f32 to vector<8x128xf32>
    %46 = arith.addf %44, %45 : vector<8x128xf32>
    %47 = arith.mulf %28, %4 : vector<8x128xf32>
    %48 = arith.mulf %16, %34 : vector<8x128xf32>
    %49 = arith.addf %47, %48 : vector<8x128xf32>
    %50 = math.tanh %49 : vector<8x128xf32>
    %51 = arith.mulf %46, %50 : vector<8x128xf32>
    %c0_33 = arith.constant 0 : index
    %c0_34 = arith.constant 0 : index
    %c0_35 = arith.constant 0 : index
    %52 = vector.load %arg5[%c0_33, %c0_34, %c0_35] : memref<8x8x128xf32, #tpu.memory_space<vmem>>, vector<1x8x128xf32>
    %53 = vector.shape_cast %52 : vector<1x8x128xf32> to vector<8x128xf32>
    %54 = vector.shape_cast %51 : vector<8x128xf32> to vector<1x8x128xf32>
    tpu.vector_store %arg5[%c0_33, %c0_34, %c0_35], %54 {strides = array<i32>} : memref<8x8x128xf32, #tpu.memory_space<vmem>>, vector<1x8x128xf32>,
    %c1 = arith.constant 1 : index
    %c0_36 = arith.constant 0 : index
    %c0_37 = arith.constant 0 : index
    %55 = vector.load %arg1[%c1, %c0_36, %c0_37] : memref<8x8x512xf32, #tpu.memory_space<vmem>>, vector<1x8x128xf32>
    %56 = vector.shape_cast %55 : vector<1x8x128xf32> to vector<8x128xf32>
    %c0_38 = arith.constant 0 : index
    %c0_39 = arith.constant 0 : index
    %57 = vector.load %arg4[%c0_38, %c0_39] : memref<128x512xf32, #tpu.memory_space<vmem>>, vector<128x128xf32>
    %cst_40 = arith.constant dense<0.000000e+00> : vector<8x128xf32>
    %58 = tpu.matmul %51, %57, %cst_40 {dimension_numbers = #tpu.dot_dimension_numbers<[1], [0], [0], [1], [0, 0, 1, 1], [], []>} : vector<8x128xf32>, vector<128x128xf32>, vector<8x128xf32> -> vector<8x128xf32>
    %59 = arith.addf %56, %58 : vector<8x128xf32>
    %cst_41 = arith.constant 5.000000e-01 : f32
    %60 = vector.broadcast %cst_41 : f32 to vector<8x128xf32>
    %61 = arith.mulf %60, %59 : vector<8x128xf32>
    %62 = math.tanh %61 : vector<8x128xf32>
    %cst_42 = arith.constant 5.000000e-01 : f32
    %63 = vector.broadcast %cst_42 : f32 to vector<8x128xf32>
    %64 = arith.mulf %63, %62 : vector<8x128xf32>
    %cst_43 = arith.constant 5.000000e-01 : f32
    %65 = vector.broadcast %cst_43 : f32 to vector<8x128xf32>
    %66 = arith.addf %64, %65 : vector<8x128xf32>
    %c1_44 = arith.constant 1 : index
    %c0_45 = arith.constant 0 : index
    %c128_46 = arith.constant 128 : index
    %67 = vector.load %arg1[%c1_44, %c0_45, %c128_46] : memref<8x8x512xf32, #tpu.memory_space<vmem>>, vector<1x8x128xf32>
    %68 = vector.shape_cast %67 : vector<1x8x128xf32> to vector<8x128xf32>
    %c0_47 = arith.constant 0 : index
    %c128_48 = arith.constant 128 : index
    %69 = vector.load %arg4[%c0_47, %c128_48] : memref<128x512xf32, #tpu.memory_space<vmem>>, vector<128x128xf32>
    %cst_49 = arith.constant dense<0.000000e+00> : vector<8x128xf32>
    %70 = tpu.matmul %51, %69, %cst_49 {dimension_numbers = #tpu.dot_dimension_numbers<[1], [0], [0], [1], [0, 0, 1, 1], [], []>} : vector<8x128xf32>, vector<128x128xf32>, vector<8x128xf32> -> vector<8x128xf32>
    %71 = arith.addf %68, %70 : vector<8x128xf32>
    %cst_50 = arith.constant 5.000000e-01 : f32
    %72 = vector.broadcast %cst_50 : f32 to vector<8x128xf32>
    %73 = arith.mulf %72, %71 : vector<8x128xf32>
    %74 = math.tanh %73 : vector<8x128xf32>
    %cst_51 = arith.constant 5.000000e-01 : f32
    %75 = vector.broadcast %cst_51 : f32 to vector<8x128xf32>
    %76 = arith.mulf %75, %74 : vector<8x128xf32>
    %cst_52 = arith.constant 5.000000e-01 : f32
    %77 = vector.broadcast %cst_52 : f32 to vector<8x128xf32>
    %78 = arith.addf %76, %77 : vector<8x128xf32>
    %c1_53 = arith.constant 1 : index
    %c0_54 = arith.constant 0 : index
    %c256_55 = arith.constant 256 : index
    %79 = vector.load %arg1[%c1_53, %c0_54, %c256_55] : memref<8x8x512xf32, #tpu.memory_space<vmem>>, vector<1x8x128xf32>
    %80 = vector.shape_cast %79 : vector<1x8x128xf32> to vector<8x128xf32>
    %c0_56 = arith.constant 0 : index
    %c256_57 = arith.constant 256 : index
    %81 = vector.load %arg4[%c0_56, %c256_57] : memref<128x512xf32, #tpu.memory_space<vmem>>, vector<128x128xf32>
    %cst_58 = arith.constant dense<0.000000e+00> : vector<8x128xf32>
    %82 = tpu.matmul %51, %81, %cst_58 {dimension_numbers = #tpu.dot_dimension_numbers<[1], [0], [0], [1], [0, 0, 1, 1], [], []>} : vector<8x128xf32>, vector<128x128xf32>, vector<8x128xf32> -> vector<8x128xf32>
    %83 = arith.addf %80, %82 : vector<8x128xf32>
    %84 = math.tanh %83 : vector<8x128xf32>
    %c1_59 = arith.constant 1 : index
    %c0_60 = arith.constant 0 : index
    %c384_61 = arith.constant 384 : index
    %85 = vector.load %arg1[%c1_59, %c0_60, %c384_61] : memref<8x8x512xf32, #tpu.memory_space<vmem>>, vector<1x8x128xf32>
    %86 = vector.shape_cast %85 : vector<1x8x128xf32> to vector<8x128xf32>
    %c0_62 = arith.constant 0 : index
    %c384_63 = arith.constant 384 : index
    %87 = vector.load %arg4[%c0_62, %c384_63] : memref<128x512xf32, #tpu.memory_space<vmem>>, vector<128x128xf32>
    %cst_64 = arith.constant dense<0.000000e+00> : vector<8x128xf32>
    %88 = tpu.matmul %51, %87, %cst_64 {dimension_numbers = #tpu.dot_dimension_numbers<[1], [0], [0], [1], [0, 0, 1, 1], [], []>} : vector<8x128xf32>, vector<128x128xf32>, vector<8x128xf32> -> vector<8x128xf32>
    %89 = arith.addf %86, %88 : vector<8x128xf32>
    %cst_65 = arith.constant 5.000000e-01 : f32
    %90 = vector.broadcast %cst_65 : f32 to vector<8x128xf32>
    %91 = arith.mulf %90, %89 : vector<8x128xf32>
    %92 = math.tanh %91 : vector<8x128xf32>
    %cst_66 = arith.constant 5.000000e-01 : f32
    %93 = vector.broadcast %cst_66 : f32 to vector<8x128xf32>
    %94 = arith.mulf %93, %92 : vector<8x128xf32>
    %cst_67 = arith.constant 5.000000e-01 : f32
    %95 = vector.broadcast %cst_67 : f32 to vector<8x128xf32>
    %96 = arith.addf %94, %95 : vector<8x128xf32>
    %97 = arith.mulf %78, %49 : vector<8x128xf32>
    %98 = arith.mulf %66, %84 : vector<8x128xf32>
    %99 = arith.addf %97, %98 : vector<8x128xf32>
    %100 = math.tanh %99 : vector<8x128xf32>
    %101 = arith.mulf %96, %100 : vector<8x128xf32>
    %c1_68 = arith.constant 1 : index
    %c0_69 = arith.constant 0 : index
    %c0_70 = arith.constant 0 : index
    %102 = vector.load %arg5[%c1_68, %c0_69, %c0_70] : memref<8x8x128xf32, #tpu.memory_space<vmem>>, vector<1x8x128xf32>
    %103 = vector.shape_cast %102 : vector<1x8x128xf32> to vector<8x128xf32>
    %104 = vector.shape_cast %101 : vector<8x128xf32> to vector<1x8x128xf32>
    tpu.vector_store %arg5[%c1_68, %c0_69, %c0_70], %104 {strides = array<i32>} : memref<8x8x128xf32, #tpu.memory_space<vmem>>, vector<1x8x128xf32>,
    %c2 = arith.constant 2 : index
    %c0_71 = arith.constant 0 : index
    %c0_72 = arith.constant 0 : index
    %105 = vector.load %arg1[%c2, %c0_71, %c0_72] : memref<8x8x512xf32, #tpu.memory_space<vmem>>, vector<1x8x128xf32>
    %106 = vector.shape_cast %105 : vector<1x8x128xf32> to vector<8x128xf32>
    %c0_73 = arith.constant 0 : index
    %c0_74 = arith.constant 0 : index
    %107 = vector.load %arg4[%c0_73, %c0_74] : memref<128x512xf32, #tpu.memory_space<vmem>>, vector<128x128xf32>
    %cst_75 = arith.constant dense<0.000000e+00> : vector<8x128xf32>
    %108 = tpu.matmul %101, %107, %cst_75 {dimension_numbers = #tpu.dot_dimension_numbers<[1], [0], [0], [1], [0, 0, 1, 1], [], []>} : vector<8x128xf32>, vector<128x128xf32>, vector<8x128xf32> -> vector<8x128xf32>
    %109 = arith.addf %106, %108 : vector<8x128xf32>
    %cst_76 = arith.constant 5.000000e-01 : f32
    %110 = vector.broadcast %cst_76 : f32 to vector<8x128xf32>
    %111 = arith.mulf %110, %109 : vector<8x128xf32>
    %112 = math.tanh %111 : vector<8x128xf32>
    %cst_77 = arith.constant 5.000000e-01 : f32
    %113 = vector.broadcast %cst_77 : f32 to vector<8x128xf32>
    %114 = arith.mulf %113, %112 : vector<8x128xf32>
    %cst_78 = arith.constant 5.000000e-01 : f32
    %115 = vector.broadcast %cst_78 : f32 to vector<8x128xf32>
    %116 = arith.addf %114, %115 : vector<8x128xf32>
    %c2_79 = arith.constant 2 : index
    %c0_80 = arith.constant 0 : index
    %c128_81 = arith.constant 128 : index
    %117 = vector.load %arg1[%c2_79, %c0_80, %c128_81] : memref<8x8x512xf32, #tpu.memory_space<vmem>>, vector<1x8x128xf32>
    %118 = vector.shape_cast %117 : vector<1x8x128xf32> to vector<8x128xf32>
    %c0_82 = arith.constant 0 : index
    %c128_83 = arith.constant 128 : index
    %119 = vector.load %arg4[%c0_82, %c128_83] : memref<128x512xf32, #tpu.memory_space<vmem>>, vector<128x128xf32>
    %cst_84 = arith.constant dense<0.000000e+00> : vector<8x128xf32>
    %120 = tpu.matmul %101, %119, %cst_84 {dimension_numbers = #tpu.dot_dimension_numbers<[1], [0], [0], [1], [0, 0, 1, 1], [], []>} : vector<8x128xf32>, vector<128x128xf32>, vector<8x128xf32> -> vector<8x128xf32>
    %121 = arith.addf %118, %120 : vector<8x128xf32>
    %cst_85 = arith.constant 5.000000e-01 : f32
    %122 = vector.broadcast %cst_85 : f32 to vector<8x128xf32>
    %123 = arith.mulf %122, %121 : vector<8x128xf32>
    %124 = math.tanh %123 : vector<8x128xf32>
    %cst_86 = arith.constant 5.000000e-01 : f32
    %125 = vector.broadcast %cst_86 : f32 to vector<8x128xf32>
    %126 = arith.mulf %125, %124 : vector<8x128xf32>
    %cst_87 = arith.constant 5.000000e-01 : f32
    %127 = vector.broadcast %cst_87 : f32 to vector<8x128xf32>
    %128 = arith.addf %126, %127 : vector<8x128xf32>
    %c2_88 = arith.constant 2 : index
    %c0_89 = arith.constant 0 : index
    %c256_90 = arith.constant 256 : index
    %129 = vector.load %arg1[%c2_88, %c0_89, %c256_90] : memref<8x8x512xf32, #tpu.memory_space<vmem>>, vector<1x8x128xf32>
    %130 = vector.shape_cast %129 : vector<1x8x128xf32> to vector<8x128xf32>
    %c0_91 = arith.constant 0 : index
    %c256_92 = arith.constant 256 : index
    %131 = vector.load %arg4[%c0_91, %c256_92] : memref<128x512xf32, #tpu.memory_space<vmem>>, vector<128x128xf32>
    %cst_93 = arith.constant dense<0.000000e+00> : vector<8x128xf32>
    %132 = tpu.matmul %101, %131, %cst_93 {dimension_numbers = #tpu.dot_dimension_numbers<[1], [0], [0], [1], [0, 0, 1, 1], [], []>} : vector<8x128xf32>, vector<128x128xf32>, vector<8x128xf32> -> vector<8x128xf32>
    %133 = arith.addf %130, %132 : vector<8x128xf32>
    %134 = math.tanh %133 : vector<8x128xf32>
    %c2_94 = arith.constant 2 : index
    %c0_95 = arith.constant 0 : index
    %c384_96 = arith.constant 384 : index
    %135 = vector.load %arg1[%c2_94, %c0_95, %c384_96] : memref<8x8x512xf32, #tpu.memory_space<vmem>>, vector<1x8x128xf32>
    %136 = vector.shape_cast %135 : vector<1x8x128xf32> to vector<8x128xf32>
    %c0_97 = arith.constant 0 : index
    %c384_98 = arith.constant 384 : index
    %137 = vector.load %arg4[%c0_97, %c384_98] : memref<128x512xf32, #tpu.memory_space<vmem>>, vector<128x128xf32>
    %cst_99 = arith.constant dense<0.000000e+00> : vector<8x128xf32>
    %138 = tpu.matmul %101, %137, %cst_99 {dimension_numbers = #tpu.dot_dimension_numbers<[1], [0], [0], [1], [0, 0, 1, 1], [], []>} : vector<8x128xf32>, vector<128x128xf32>, vector<8x128xf32> -> vector<8x128xf32>
    %139 = arith.addf %136, %138 : vector<8x128xf32>
    %cst_100 = arith.constant 5.000000e-01 : f32
    %140 = vector.broadcast %cst_100 : f32 to vector<8x128xf32>
    %141 = arith.mulf %140, %139 : vector<8x128xf32>
    %142 = math.tanh %141 : vector<8x128xf32>
    %cst_101 = arith.constant 5.000000e-01 : f32
    %143 = vector.broadcast %cst_101 : f32 to vector<8x128xf32>
    %144 = arith.mulf %143, %142 : vector<8x128xf32>
    %cst_102 = arith.constant 5.000000e-01 : f32
    %145 = vector.broadcast %cst_102 : f32 to vector<8x128xf32>
    %146 = arith.addf %144, %145 : vector<8x128xf32>
    %147 = arith.mulf %128, %99 : vector<8x128xf32>
    %148 = arith.mulf %116, %134 : vector<8x128xf32>
    %149 = arith.addf %147, %148 : vector<8x128xf32>
    %150 = math.tanh %149 : vector<8x128xf32>
    %151 = arith.mulf %146, %150 : vector<8x128xf32>
    %c2_103 = arith.constant 2 : index
    %c0_104 = arith.constant 0 : index
    %c0_105 = arith.constant 0 : index
    %152 = vector.load %arg5[%c2_103, %c0_104, %c0_105] : memref<8x8x128xf32, #tpu.memory_space<vmem>>, vector<1x8x128xf32>
    %153 = vector.shape_cast %152 : vector<1x8x128xf32> to vector<8x128xf32>
    %154 = vector.shape_cast %151 : vector<8x128xf32> to vector<1x8x128xf32>
    tpu.vector_store %arg5[%c2_103, %c0_104, %c0_105], %154 {strides = array<i32>} : memref<8x8x128xf32, #tpu.memory_space<vmem>>, vector<1x8x128xf32>,
    %c3 = arith.constant 3 : index
    %c0_106 = arith.constant 0 : index
    %c0_107 = arith.constant 0 : index
    %155 = vector.load %arg1[%c3, %c0_106, %c0_107] : memref<8x8x512xf32, #tpu.memory_space<vmem>>, vector<1x8x128xf32>
    %156 = vector.shape_cast %155 : vector<1x8x128xf32> to vector<8x128xf32>
    %c0_108 = arith.constant 0 : index
    %c0_109 = arith.constant 0 : index
    %157 = vector.load %arg4[%c0_108, %c0_109] : memref<128x512xf32, #tpu.memory_space<vmem>>, vector<128x128xf32>
    %cst_110 = arith.constant dense<0.000000e+00> : vector<8x128xf32>
    %158 = tpu.matmul %151, %157, %cst_110 {dimension_numbers = #tpu.dot_dimension_numbers<[1], [0], [0], [1], [0, 0, 1, 1], [], []>} : vector<8x128xf32>, vector<128x128xf32>, vector<8x128xf32> -> vector<8x128xf32>
    %159 = arith.addf %156, %158 : vector<8x128xf32>
    %cst_111 = arith.constant 5.000000e-01 : f32
    %160 = vector.broadcast %cst_111 : f32 to vector<8x128xf32>
    %161 = arith.mulf %160, %159 : vector<8x128xf32>
    %162 = math.tanh %161 : vector<8x128xf32>
    %cst_112 = arith.constant 5.000000e-01 : f32
    %163 = vector.broadcast %cst_112 : f32 to vector<8x128xf32>
    %164 = arith.mulf %163, %162 : vector<8x128xf32>
    %cst_113 = arith.constant 5.000000e-01 : f32
    %165 = vector.broadcast %cst_113 : f32 to vector<8x128xf32>
    %166 = arith.addf %164, %165 : vector<8x128xf32>
    %c3_114 = arith.constant 3 : index
    %c0_115 = arith.constant 0 : index
    %c128_116 = arith.constant 128 : index
    %167 = vector.load %arg1[%c3_114, %c0_115, %c128_116] : memref<8x8x512xf32, #tpu.memory_space<vmem>>, vector<1x8x128xf32>
    %168 = vector.shape_cast %167 : vector<1x8x128xf32> to vector<8x128xf32>
    %c0_117 = arith.constant 0 : index
    %c128_118 = arith.constant 128 : index
    %169 = vector.load %arg4[%c0_117, %c128_118] : memref<128x512xf32, #tpu.memory_space<vmem>>, vector<128x128xf32>
    %cst_119 = arith.constant dense<0.000000e+00> : vector<8x128xf32>
    %170 = tpu.matmul %151, %169, %cst_119 {dimension_numbers = #tpu.dot_dimension_numbers<[1], [0], [0], [1], [0, 0, 1, 1], [], []>} : vector<8x128xf32>, vector<128x128xf32>, vector<8x128xf32> -> vector<8x128xf32>
    %171 = arith.addf %168, %170 : vector<8x128xf32>
    %cst_120 = arith.constant 5.000000e-01 : f32
    %172 = vector.broadcast %cst_120 : f32 to vector<8x128xf32>
    %173 = arith.mulf %172, %171 : vector<8x128xf32>
    %174 = math.tanh %173 : vector<8x128xf32>
    %cst_121 = arith.constant 5.000000e-01 : f32
    %175 = vector.broadcast %cst_121 : f32 to vector<8x128xf32>
    %176 = arith.mulf %175, %174 : vector<8x128xf32>
    %cst_122 = arith.constant 5.000000e-01 : f32
    %177 = vector.broadcast %cst_122 : f32 to vector<8x128xf32>
    %178 = arith.addf %176, %177 : vector<8x128xf32>
    %c3_123 = arith.constant 3 : index
    %c0_124 = arith.constant 0 : index
    %c256_125 = arith.constant 256 : index
    %179 = vector.load %arg1[%c3_123, %c0_124, %c256_125] : memref<8x8x512xf32, #tpu.memory_space<vmem>>, vector<1x8x128xf32>
    %180 = vector.shape_cast %179 : vector<1x8x128xf32> to vector<8x128xf32>
    %c0_126 = arith.constant 0 : index
    %c256_127 = arith.constant 256 : index
    %181 = vector.load %arg4[%c0_126, %c256_127] : memref<128x512xf32, #tpu.memory_space<vmem>>, vector<128x128xf32>
    %cst_128 = arith.constant dense<0.000000e+00> : vector<8x128xf32>
    %182 = tpu.matmul %151, %181, %cst_128 {dimension_numbers = #tpu.dot_dimension_numbers<[1], [0], [0], [1], [0, 0, 1, 1], [], []>} : vector<8x128xf32>, vector<128x128xf32>, vector<8x128xf32> -> vector<8x128xf32>
    %183 = arith.addf %180, %182 : vector<8x128xf32>
    %184 = math.tanh %183 : vector<8x128xf32>
    %c3_129 = arith.constant 3 : index
    %c0_130 = arith.constant 0 : index
    %c384_131 = arith.constant 384 : index
    %185 = vector.load %arg1[%c3_129, %c0_130, %c384_131] : memref<8x8x512xf32, #tpu.memory_space<vmem>>, vector<1x8x128xf32>
    %186 = vector.shape_cast %185 : vector<1x8x128xf32> to vector<8x128xf32>
    %c0_132 = arith.constant 0 : index
    %c384_133 = arith.constant 384 : index
    %187 = vector.load %arg4[%c0_132, %c384_133] : memref<128x512xf32, #tpu.memory_space<vmem>>, vector<128x128xf32>
    %cst_134 = arith.constant dense<0.000000e+00> : vector<8x128xf32>
    %188 = tpu.matmul %151, %187, %cst_134 {dimension_numbers = #tpu.dot_dimension_numbers<[1], [0], [0], [1], [0, 0, 1, 1], [], []>} : vector<8x128xf32>, vector<128x128xf32>, vector<8x128xf32> -> vector<8x128xf32>
    %189 = arith.addf %186, %188 : vector<8x128xf32>
    %cst_135 = arith.constant 5.000000e-01 : f32
    %190 = vector.broadcast %cst_135 : f32 to vector<8x128xf32>
    %191 = arith.mulf %190, %189 : vector<8x128xf32>
    %192 = math.tanh %191 : vector<8x128xf32>
    %cst_136 = arith.constant 5.000000e-01 : f32
    %193 = vector.broadcast %cst_136 : f32 to vector<8x128xf32>
    %194 = arith.mulf %193, %192 : vector<8x128xf32>
    %cst_137 = arith.constant 5.000000e-01 : f32
    %195 = vector.broadcast %cst_137 : f32 to vector<8x128xf32>
    %196 = arith.addf %194, %195 : vector<8x128xf32>
    %197 = arith.mulf %178, %149 : vector<8x128xf32>
    %198 = arith.mulf %166, %184 : vector<8x128xf32>
    %199 = arith.addf %197, %198 : vector<8x128xf32>
    %200 = math.tanh %199 : vector<8x128xf32>
    %201 = arith.mulf %196, %200 : vector<8x128xf32>
    %c3_138 = arith.constant 3 : index
    %c0_139 = arith.constant 0 : index
    %c0_140 = arith.constant 0 : index
    %202 = vector.load %arg5[%c3_138, %c0_139, %c0_140] : memref<8x8x128xf32, #tpu.memory_space<vmem>>, vector<1x8x128xf32>
    %203 = vector.shape_cast %202 : vector<1x8x128xf32> to vector<8x128xf32>
    %204 = vector.shape_cast %201 : vector<8x128xf32> to vector<1x8x128xf32>
    tpu.vector_store %arg5[%c3_138, %c0_139, %c0_140], %204 {strides = array<i32>} : memref<8x8x128xf32, #tpu.memory_space<vmem>>, vector<1x8x128xf32>,
    %c4 = arith.constant 4 : index
    %c0_141 = arith.constant 0 : index
    %c0_142 = arith.constant 0 : index
    %205 = vector.load %arg1[%c4, %c0_141, %c0_142] : memref<8x8x512xf32, #tpu.memory_space<vmem>>, vector<1x8x128xf32>
    %206 = vector.shape_cast %205 : vector<1x8x128xf32> to vector<8x128xf32>
    %c0_143 = arith.constant 0 : index
    %c0_144 = arith.constant 0 : index
    %207 = vector.load %arg4[%c0_143, %c0_144] : memref<128x512xf32, #tpu.memory_space<vmem>>, vector<128x128xf32>
    %cst_145 = arith.constant dense<0.000000e+00> : vector<8x128xf32>
    %208 = tpu.matmul %201, %207, %cst_145 {dimension_numbers = #tpu.dot_dimension_numbers<[1], [0], [0], [1], [0, 0, 1, 1], [], []>} : vector<8x128xf32>, vector<128x128xf32>, vector<8x128xf32> -> vector<8x128xf32>
    %209 = arith.addf %206, %208 : vector<8x128xf32>
    %cst_146 = arith.constant 5.000000e-01 : f32
    %210 = vector.broadcast %cst_146 : f32 to vector<8x128xf32>
    %211 = arith.mulf %210, %209 : vector<8x128xf32>
    %212 = math.tanh %211 : vector<8x128xf32>
    %cst_147 = arith.constant 5.000000e-01 : f32
    %213 = vector.broadcast %cst_147 : f32 to vector<8x128xf32>
    %214 = arith.mulf %213, %212 : vector<8x128xf32>
    %cst_148 = arith.constant 5.000000e-01 : f32
    %215 = vector.broadcast %cst_148 : f32 to vector<8x128xf32>
    %216 = arith.addf %214, %215 : vector<8x128xf32>
    %c4_149 = arith.constant 4 : index
    %c0_150 = arith.constant 0 : index
    %c128_151 = arith.constant 128 : index
    %217 = vector.load %arg1[%c4_149, %c0_150, %c128_151] : memref<8x8x512xf32, #tpu.memory_space<vmem>>, vector<1x8x128xf32>
    %218 = vector.shape_cast %217 : vector<1x8x128xf32> to vector<8x128xf32>
    %c0_152 = arith.constant 0 : index
    %c128_153 = arith.constant 128 : index
    %219 = vector.load %arg4[%c0_152, %c128_153] : memref<128x512xf32, #tpu.memory_space<vmem>>, vector<128x128xf32>
    %cst_154 = arith.constant dense<0.000000e+00> : vector<8x128xf32>
    %220 = tpu.matmul %201, %219, %cst_154 {dimension_numbers = #tpu.dot_dimension_numbers<[1], [0], [0], [1], [0, 0, 1, 1], [], []>} : vector<8x128xf32>, vector<128x128xf32>, vector<8x128xf32> -> vector<8x128xf32>
    %221 = arith.addf %218, %220 : vector<8x128xf32>
    %cst_155 = arith.constant 5.000000e-01 : f32
    %222 = vector.broadcast %cst_155 : f32 to vector<8x128xf32>
    %223 = arith.mulf %222, %221 : vector<8x128xf32>
    %224 = math.tanh %223 : vector<8x128xf32>
    %cst_156 = arith.constant 5.000000e-01 : f32
    %225 = vector.broadcast %cst_156 : f32 to vector<8x128xf32>
    %226 = arith.mulf %225, %224 : vector<8x128xf32>
    %cst_157 = arith.constant 5.000000e-01 : f32
    %227 = vector.broadcast %cst_157 : f32 to vector<8x128xf32>
    %228 = arith.addf %226, %227 : vector<8x128xf32>
    %c4_158 = arith.constant 4 : index
    %c0_159 = arith.constant 0 : index
    %c256_160 = arith.constant 256 : index
    %229 = vector.load %arg1[%c4_158, %c0_159, %c256_160] : memref<8x8x512xf32, #tpu.memory_space<vmem>>, vector<1x8x128xf32>
    %230 = vector.shape_cast %229 : vector<1x8x128xf32> to vector<8x128xf32>
    %c0_161 = arith.constant 0 : index
    %c256_162 = arith.constant 256 : index
    %231 = vector.load %arg4[%c0_161, %c256_162] : memref<128x512xf32, #tpu.memory_space<vmem>>, vector<128x128xf32>
    %cst_163 = arith.constant dense<0.000000e+00> : vector<8x128xf32>
    %232 = tpu.matmul %201, %231, %cst_163 {dimension_numbers = #tpu.dot_dimension_numbers<[1], [0], [0], [1], [0, 0, 1, 1], [], []>} : vector<8x128xf32>, vector<128x128xf32>, vector<8x128xf32> -> vector<8x128xf32>
    %233 = arith.addf %230, %232 : vector<8x128xf32>
    %234 = math.tanh %233 : vector<8x128xf32>
    %c4_164 = arith.constant 4 : index
    %c0_165 = arith.constant 0 : index
    %c384_166 = arith.constant 384 : index
    %235 = vector.load %arg1[%c4_164, %c0_165, %c384_166] : memref<8x8x512xf32, #tpu.memory_space<vmem>>, vector<1x8x128xf32>
    %236 = vector.shape_cast %235 : vector<1x8x128xf32> to vector<8x128xf32>
    %c0_167 = arith.constant 0 : index
    %c384_168 = arith.constant 384 : index
    %237 = vector.load %arg4[%c0_167, %c384_168] : memref<128x512xf32, #tpu.memory_space<vmem>>, vector<128x128xf32>
    %cst_169 = arith.constant dense<0.000000e+00> : vector<8x128xf32>
    %238 = tpu.matmul %201, %237, %cst_169 {dimension_numbers = #tpu.dot_dimension_numbers<[1], [0], [0], [1], [0, 0, 1, 1], [], []>} : vector<8x128xf32>, vector<128x128xf32>, vector<8x128xf32> -> vector<8x128xf32>
    %239 = arith.addf %236, %238 : vector<8x128xf32>
    %cst_170 = arith.constant 5.000000e-01 : f32
    %240 = vector.broadcast %cst_170 : f32 to vector<8x128xf32>
    %241 = arith.mulf %240, %239 : vector<8x128xf32>
    %242 = math.tanh %241 : vector<8x128xf32>
    %cst_171 = arith.constant 5.000000e-01 : f32
    %243 = vector.broadcast %cst_171 : f32 to vector<8x128xf32>
    %244 = arith.mulf %243, %242 : vector<8x128xf32>
    %cst_172 = arith.constant 5.000000e-01 : f32
    %245 = vector.broadcast %cst_172 : f32 to vector<8x128xf32>
    %246 = arith.addf %244, %245 : vector<8x128xf32>
    %247 = arith.mulf %228, %199 : vector<8x128xf32>
    %248 = arith.mulf %216, %234 : vector<8x128xf32>
    %249 = arith.addf %247, %248 : vector<8x128xf32>
    %250 = math.tanh %249 : vector<8x128xf32>
    %251 = arith.mulf %246, %250 : vector<8x128xf32>
    %c4_173 = arith.constant 4 : index
    %c0_174 = arith.constant 0 : index
    %c0_175 = arith.constant 0 : index
    %252 = vector.load %arg5[%c4_173, %c0_174, %c0_175] : memref<8x8x128xf32, #tpu.memory_space<vmem>>, vector<1x8x128xf32>
    %253 = vector.shape_cast %252 : vector<1x8x128xf32> to vector<8x128xf32>
    %254 = vector.shape_cast %251 : vector<8x128xf32> to vector<1x8x128xf32>
    tpu.vector_store %arg5[%c4_173, %c0_174, %c0_175], %254 {strides = array<i32>} : memref<8x8x128xf32, #tpu.memory_space<vmem>>, vector<1x8x128xf32>,
    %c5 = arith.constant 5 : index
    %c0_176 = arith.constant 0 : index
    %c0_177 = arith.constant 0 : index
    %255 = vector.load %arg1[%c5, %c0_176, %c0_177] : memref<8x8x512xf32, #tpu.memory_space<vmem>>, vector<1x8x128xf32>
    %256 = vector.shape_cast %255 : vector<1x8x128xf32> to vector<8x128xf32>
    %c0_178 = arith.constant 0 : index
    %c0_179 = arith.constant 0 : index
    %257 = vector.load %arg4[%c0_178, %c0_179] : memref<128x512xf32, #tpu.memory_space<vmem>>, vector<128x128xf32>
    %cst_180 = arith.constant dense<0.000000e+00> : vector<8x128xf32>
    %258 = tpu.matmul %251, %257, %cst_180 {dimension_numbers = #tpu.dot_dimension_numbers<[1], [0], [0], [1], [0, 0, 1, 1], [], []>} : vector<8x128xf32>, vector<128x128xf32>, vector<8x128xf32> -> vector<8x128xf32>
    %259 = arith.addf %256, %258 : vector<8x128xf32>
    %cst_181 = arith.constant 5.000000e-01 : f32
    %260 = vector.broadcast %cst_181 : f32 to vector<8x128xf32>
    %261 = arith.mulf %260, %259 : vector<8x128xf32>
    %262 = math.tanh %261 : vector<8x128xf32>
    %cst_182 = arith.constant 5.000000e-01 : f32
    %263 = vector.broadcast %cst_182 : f32 to vector<8x128xf32>
    %264 = arith.mulf %263, %262 : vector<8x128xf32>
    %cst_183 = arith.constant 5.000000e-01 : f32
    %265 = vector.broadcast %cst_183 : f32 to vector<8x128xf32>
    %266 = arith.addf %264, %265 : vector<8x128xf32>
    %c5_184 = arith.constant 5 : index
    %c0_185 = arith.constant 0 : index
    %c128_186 = arith.constant 128 : index
    %267 = vector.load %arg1[%c5_184, %c0_185, %c128_186] : memref<8x8x512xf32, #tpu.memory_space<vmem>>, vector<1x8x128xf32>
    %268 = vector.shape_cast %267 : vector<1x8x128xf32> to vector<8x128xf32>
    %c0_187 = arith.constant 0 : index
    %c128_188 = arith.constant 128 : index
    %269 = vector.load %arg4[%c0_187, %c128_188] : memref<128x512xf32, #tpu.memory_space<vmem>>, vector<128x128xf32>
    %cst_189 = arith.constant dense<0.000000e+00> : vector<8x128xf32>
    %270 = tpu.matmul %251, %269, %cst_189 {dimension_numbers = #tpu.dot_dimension_numbers<[1], [0], [0], [1], [0, 0, 1, 1], [], []>} : vector<8x128xf32>, vector<128x128xf32>, vector<8x128xf32> -> vector<8x128xf32>
    %271 = arith.addf %268, %270 : vector<8x128xf32>
    %cst_190 = arith.constant 5.000000e-01 : f32
    %272 = vector.broadcast %cst_190 : f32 to vector<8x128xf32>
    %273 = arith.mulf %272, %271 : vector<8x128xf32>
    %274 = math.tanh %273 : vector<8x128xf32>
    %cst_191 = arith.constant 5.000000e-01 : f32
    %275 = vector.broadcast %cst_191 : f32 to vector<8x128xf32>
    %276 = arith.mulf %275, %274 : vector<8x128xf32>
    %cst_192 = arith.constant 5.000000e-01 : f32
    %277 = vector.broadcast %cst_192 : f32 to vector<8x128xf32>
    %278 = arith.addf %276, %277 : vector<8x128xf32>
    %c5_193 = arith.constant 5 : index
    %c0_194 = arith.constant 0 : index
    %c256_195 = arith.constant 256 : index
    %279 = vector.load %arg1[%c5_193, %c0_194, %c256_195] : memref<8x8x512xf32, #tpu.memory_space<vmem>>, vector<1x8x128xf32>
    %280 = vector.shape_cast %279 : vector<1x8x128xf32> to vector<8x128xf32>
    %c0_196 = arith.constant 0 : index
    %c256_197 = arith.constant 256 : index
    %281 = vector.load %arg4[%c0_196, %c256_197] : memref<128x512xf32, #tpu.memory_space<vmem>>, vector<128x128xf32>
    %cst_198 = arith.constant dense<0.000000e+00> : vector<8x128xf32>
    %282 = tpu.matmul %251, %281, %cst_198 {dimension_numbers = #tpu.dot_dimension_numbers<[1], [0], [0], [1], [0, 0, 1, 1], [], []>} : vector<8x128xf32>, vector<128x128xf32>, vector<8x128xf32> -> vector<8x128xf32>
    %283 = arith.addf %280, %282 : vector<8x128xf32>
    %284 = math.tanh %283 : vector<8x128xf32>
    %c5_199 = arith.constant 5 : index
    %c0_200 = arith.constant 0 : index
    %c384_201 = arith.constant 384 : index
    %285 = vector.load %arg1[%c5_199, %c0_200, %c384_201] : memref<8x8x512xf32, #tpu.memory_space<vmem>>, vector<1x8x128xf32>
    %286 = vector.shape_cast %285 : vector<1x8x128xf32> to vector<8x128xf32>
    %c0_202 = arith.constant 0 : index
    %c384_203 = arith.constant 384 : index
    %287 = vector.load %arg4[%c0_202, %c384_203] : memref<128x512xf32, #tpu.memory_space<vmem>>, vector<128x128xf32>
    %cst_204 = arith.constant dense<0.000000e+00> : vector<8x128xf32>
    %288 = tpu.matmul %251, %287, %cst_204 {dimension_numbers = #tpu.dot_dimension_numbers<[1], [0], [0], [1], [0, 0, 1, 1], [], []>} : vector<8x128xf32>, vector<128x128xf32>, vector<8x128xf32> -> vector<8x128xf32>
    %289 = arith.addf %286, %288 : vector<8x128xf32>
    %cst_205 = arith.constant 5.000000e-01 : f32
    %290 = vector.broadcast %cst_205 : f32 to vector<8x128xf32>
    %291 = arith.mulf %290, %289 : vector<8x128xf32>
    %292 = math.tanh %291 : vector<8x128xf32>
    %cst_206 = arith.constant 5.000000e-01 : f32
    %293 = vector.broadcast %cst_206 : f32 to vector<8x128xf32>
    %294 = arith.mulf %293, %292 : vector<8x128xf32>
    %cst_207 = arith.constant 5.000000e-01 : f32
    %295 = vector.broadcast %cst_207 : f32 to vector<8x128xf32>
    %296 = arith.addf %294, %295 : vector<8x128xf32>
    %297 = arith.mulf %278, %249 : vector<8x128xf32>
    %298 = arith.mulf %266, %284 : vector<8x128xf32>
    %299 = arith.addf %297, %298 : vector<8x128xf32>
    %300 = math.tanh %299 : vector<8x128xf32>
    %301 = arith.mulf %296, %300 : vector<8x128xf32>
    %c5_208 = arith.constant 5 : index
    %c0_209 = arith.constant 0 : index
    %c0_210 = arith.constant 0 : index
    %302 = vector.load %arg5[%c5_208, %c0_209, %c0_210] : memref<8x8x128xf32, #tpu.memory_space<vmem>>, vector<1x8x128xf32>
    %303 = vector.shape_cast %302 : vector<1x8x128xf32> to vector<8x128xf32>
    %304 = vector.shape_cast %301 : vector<8x128xf32> to vector<1x8x128xf32>
    tpu.vector_store %arg5[%c5_208, %c0_209, %c0_210], %304 {strides = array<i32>} : memref<8x8x128xf32, #tpu.memory_space<vmem>>, vector<1x8x128xf32>,
    %c6 = arith.constant 6 : index
    %c0_211 = arith.constant 0 : index
    %c0_212 = arith.constant 0 : index
    %305 = vector.load %arg1[%c6, %c0_211, %c0_212] : memref<8x8x512xf32, #tpu.memory_space<vmem>>, vector<1x8x128xf32>
    %306 = vector.shape_cast %305 : vector<1x8x128xf32> to vector<8x128xf32>
    %c0_213 = arith.constant 0 : index
    %c0_214 = arith.constant 0 : index
    %307 = vector.load %arg4[%c0_213, %c0_214] : memref<128x512xf32, #tpu.memory_space<vmem>>, vector<128x128xf32>
    %cst_215 = arith.constant dense<0.000000e+00> : vector<8x128xf32>
    %308 = tpu.matmul %301, %307, %cst_215 {dimension_numbers = #tpu.dot_dimension_numbers<[1], [0], [0], [1], [0, 0, 1, 1], [], []>} : vector<8x128xf32>, vector<128x128xf32>, vector<8x128xf32> -> vector<8x128xf32>
    %309 = arith.addf %306, %308 : vector<8x128xf32>
    %cst_216 = arith.constant 5.000000e-01 : f32
    %310 = vector.broadcast %cst_216 : f32 to vector<8x128xf32>
    %311 = arith.mulf %310, %309 : vector<8x128xf32>
    %312 = math.tanh %311 : vector<8x128xf32>
    %cst_217 = arith.constant 5.000000e-01 : f32
    %313 = vector.broadcast %cst_217 : f32 to vector<8x128xf32>
    %314 = arith.mulf %313, %312 : vector<8x128xf32>
    %cst_218 = arith.constant 5.000000e-01 : f32
    %315 = vector.broadcast %cst_218 : f32 to vector<8x128xf32>
    %316 = arith.addf %314, %315 : vector<8x128xf32>
    %c6_219 = arith.constant 6 : index
    %c0_220 = arith.constant 0 : index
    %c128_221 = arith.constant 128 : index
    %317 = vector.load %arg1[%c6_219, %c0_220, %c128_221] : memref<8x8x512xf32, #tpu.memory_space<vmem>>, vector<1x8x128xf32>
    %318 = vector.shape_cast %317 : vector<1x8x128xf32> to vector<8x128xf32>
    %c0_222 = arith.constant 0 : index
    %c128_223 = arith.constant 128 : index
    %319 = vector.load %arg4[%c0_222, %c128_223] : memref<128x512xf32, #tpu.memory_space<vmem>>, vector<128x128xf32>
    %cst_224 = arith.constant dense<0.000000e+00> : vector<8x128xf32>
    %320 = tpu.matmul %301, %319, %cst_224 {dimension_numbers = #tpu.dot_dimension_numbers<[1], [0], [0], [1], [0, 0, 1, 1], [], []>} : vector<8x128xf32>, vector<128x128xf32>, vector<8x128xf32> -> vector<8x128xf32>
    %321 = arith.addf %318, %320 : vector<8x128xf32>
    %cst_225 = arith.constant 5.000000e-01 : f32
    %322 = vector.broadcast %cst_225 : f32 to vector<8x128xf32>
    %323 = arith.mulf %322, %321 : vector<8x128xf32>
    %324 = math.tanh %323 : vector<8x128xf32>
    %cst_226 = arith.constant 5.000000e-01 : f32
    %325 = vector.broadcast %cst_226 : f32 to vector<8x128xf32>
    %326 = arith.mulf %325, %324 : vector<8x128xf32>
    %cst_227 = arith.constant 5.000000e-01 : f32
    %327 = vector.broadcast %cst_227 : f32 to vector<8x128xf32>
    %328 = arith.addf %326, %327 : vector<8x128xf32>
    %c6_228 = arith.constant 6 : index
    %c0_229 = arith.constant 0 : index
    %c256_230 = arith.constant 256 : index
    %329 = vector.load %arg1[%c6_228, %c0_229, %c256_230] : memref<8x8x512xf32, #tpu.memory_space<vmem>>, vector<1x8x128xf32>
    %330 = vector.shape_cast %329 : vector<1x8x128xf32> to vector<8x128xf32>
    %c0_231 = arith.constant 0 : index
    %c256_232 = arith.constant 256 : index
    %331 = vector.load %arg4[%c0_231, %c256_232] : memref<128x512xf32, #tpu.memory_space<vmem>>, vector<128x128xf32>
    %cst_233 = arith.constant dense<0.000000e+00> : vector<8x128xf32>
    %332 = tpu.matmul %301, %331, %cst_233 {dimension_numbers = #tpu.dot_dimension_numbers<[1], [0], [0], [1], [0, 0, 1, 1], [], []>} : vector<8x128xf32>, vector<128x128xf32>, vector<8x128xf32> -> vector<8x128xf32>
    %333 = arith.addf %330, %332 : vector<8x128xf32>
    %334 = math.tanh %333 : vector<8x128xf32>
    %c6_234 = arith.constant 6 : index
    %c0_235 = arith.constant 0 : index
    %c384_236 = arith.constant 384 : index
    %335 = vector.load %arg1[%c6_234, %c0_235, %c384_236] : memref<8x8x512xf32, #tpu.memory_space<vmem>>, vector<1x8x128xf32>
    %336 = vector.shape_cast %335 : vector<1x8x128xf32> to vector<8x128xf32>
    %c0_237 = arith.constant 0 : index
    %c384_238 = arith.constant 384 : index
    %337 = vector.load %arg4[%c0_237, %c384_238] : memref<128x512xf32, #tpu.memory_space<vmem>>, vector<128x128xf32>
    %cst_239 = arith.constant dense<0.000000e+00> : vector<8x128xf32>
    %338 = tpu.matmul %301, %337, %cst_239 {dimension_numbers = #tpu.dot_dimension_numbers<[1], [0], [0], [1], [0, 0, 1, 1], [], []>} : vector<8x128xf32>, vector<128x128xf32>, vector<8x128xf32> -> vector<8x128xf32>
    %339 = arith.addf %336, %338 : vector<8x128xf32>
    %cst_240 = arith.constant 5.000000e-01 : f32
    %340 = vector.broadcast %cst_240 : f32 to vector<8x128xf32>
    %341 = arith.mulf %340, %339 : vector<8x128xf32>
    %342 = math.tanh %341 : vector<8x128xf32>
    %cst_241 = arith.constant 5.000000e-01 : f32
    %343 = vector.broadcast %cst_241 : f32 to vector<8x128xf32>
    %344 = arith.mulf %343, %342 : vector<8x128xf32>
    %cst_242 = arith.constant 5.000000e-01 : f32
    %345 = vector.broadcast %cst_242 : f32 to vector<8x128xf32>
    %346 = arith.addf %344, %345 : vector<8x128xf32>
    %347 = arith.mulf %328, %299 : vector<8x128xf32>
    %348 = arith.mulf %316, %334 : vector<8x128xf32>
    %349 = arith.addf %347, %348 : vector<8x128xf32>
    %350 = math.tanh %349 : vector<8x128xf32>
    %351 = arith.mulf %346, %350 : vector<8x128xf32>
    %c6_243 = arith.constant 6 : index
    %c0_244 = arith.constant 0 : index
    %c0_245 = arith.constant 0 : index
    %352 = vector.load %arg5[%c6_243, %c0_244, %c0_245] : memref<8x8x128xf32, #tpu.memory_space<vmem>>, vector<1x8x128xf32>
    %353 = vector.shape_cast %352 : vector<1x8x128xf32> to vector<8x128xf32>
    %354 = vector.shape_cast %351 : vector<8x128xf32> to vector<1x8x128xf32>
    tpu.vector_store %arg5[%c6_243, %c0_244, %c0_245], %354 {strides = array<i32>} : memref<8x8x128xf32, #tpu.memory_space<vmem>>, vector<1x8x128xf32>,
    %c7 = arith.constant 7 : index
    %c0_246 = arith.constant 0 : index
    %c0_247 = arith.constant 0 : index
    %355 = vector.load %arg1[%c7, %c0_246, %c0_247] : memref<8x8x512xf32, #tpu.memory_space<vmem>>, vector<1x8x128xf32>
    %356 = vector.shape_cast %355 : vector<1x8x128xf32> to vector<8x128xf32>
    %c0_248 = arith.constant 0 : index
    %c0_249 = arith.constant 0 : index
    %357 = vector.load %arg4[%c0_248, %c0_249] : memref<128x512xf32, #tpu.memory_space<vmem>>, vector<128x128xf32>
    %cst_250 = arith.constant dense<0.000000e+00> : vector<8x128xf32>
    %358 = tpu.matmul %351, %357, %cst_250 {dimension_numbers = #tpu.dot_dimension_numbers<[1], [0], [0], [1], [0, 0, 1, 1], [], []>} : vector<8x128xf32>, vector<128x128xf32>, vector<8x128xf32> -> vector<8x128xf32>
    %359 = arith.addf %356, %358 : vector<8x128xf32>
    %cst_251 = arith.constant 5.000000e-01 : f32
    %360 = vector.broadcast %cst_251 : f32 to vector<8x128xf32>
    %361 = arith.mulf %360, %359 : vector<8x128xf32>
    %362 = math.tanh %361 : vector<8x128xf32>
    %cst_252 = arith.constant 5.000000e-01 : f32
    %363 = vector.broadcast %cst_252 : f32 to vector<8x128xf32>
    %364 = arith.mulf %363, %362 : vector<8x128xf32>
    %cst_253 = arith.constant 5.000000e-01 : f32
    %365 = vector.broadcast %cst_253 : f32 to vector<8x128xf32>
    %366 = arith.addf %364, %365 : vector<8x128xf32>
    %c7_254 = arith.constant 7 : index
    %c0_255 = arith.constant 0 : index
    %c128_256 = arith.constant 128 : index
    %367 = vector.load %arg1[%c7_254, %c0_255, %c128_256] : memref<8x8x512xf32, #tpu.memory_space<vmem>>, vector<1x8x128xf32>
    %368 = vector.shape_cast %367 : vector<1x8x128xf32> to vector<8x128xf32>
    %c0_257 = arith.constant 0 : index
    %c128_258 = arith.constant 128 : index
    %369 = vector.load %arg4[%c0_257, %c128_258] : memref<128x512xf32, #tpu.memory_space<vmem>>, vector<128x128xf32>
    %cst_259 = arith.constant dense<0.000000e+00> : vector<8x128xf32>
    %370 = tpu.matmul %351, %369, %cst_259 {dimension_numbers = #tpu.dot_dimension_numbers<[1], [0], [0], [1], [0, 0, 1, 1], [], []>} : vector<8x128xf32>, vector<128x128xf32>, vector<8x128xf32> -> vector<8x128xf32>
    %371 = arith.addf %368, %370 : vector<8x128xf32>
    %cst_260 = arith.constant 5.000000e-01 : f32
    %372 = vector.broadcast %cst_260 : f32 to vector<8x128xf32>
    %373 = arith.mulf %372, %371 : vector<8x128xf32>
    %374 = math.tanh %373 : vector<8x128xf32>
    %cst_261 = arith.constant 5.000000e-01 : f32
    %375 = vector.broadcast %cst_261 : f32 to vector<8x128xf32>
    %376 = arith.mulf %375, %374 : vector<8x128xf32>
    %cst_262 = arith.constant 5.000000e-01 : f32
    %377 = vector.broadcast %cst_262 : f32 to vector<8x128xf32>
    %378 = arith.addf %376, %377 : vector<8x128xf32>
    %c7_263 = arith.constant 7 : index
    %c0_264 = arith.constant 0 : index
    %c256_265 = arith.constant 256 : index
    %379 = vector.load %arg1[%c7_263, %c0_264, %c256_265] : memref<8x8x512xf32, #tpu.memory_space<vmem>>, vector<1x8x128xf32>
    %380 = vector.shape_cast %379 : vector<1x8x128xf32> to vector<8x128xf32>
    %c0_266 = arith.constant 0 : index
    %c256_267 = arith.constant 256 : index
    %381 = vector.load %arg4[%c0_266, %c256_267] : memref<128x512xf32, #tpu.memory_space<vmem>>, vector<128x128xf32>
    %cst_268 = arith.constant dense<0.000000e+00> : vector<8x128xf32>
    %382 = tpu.matmul %351, %381, %cst_268 {dimension_numbers = #tpu.dot_dimension_numbers<[1], [0], [0], [1], [0, 0, 1, 1], [], []>} : vector<8x128xf32>, vector<128x128xf32>, vector<8x128xf32> -> vector<8x128xf32>
    %383 = arith.addf %380, %382 : vector<8x128xf32>
    %384 = math.tanh %383 : vector<8x128xf32>
    %c7_269 = arith.constant 7 : index
    %c0_270 = arith.constant 0 : index
    %c384_271 = arith.constant 384 : index
    %385 = vector.load %arg1[%c7_269, %c0_270, %c384_271] : memref<8x8x512xf32, #tpu.memory_space<vmem>>, vector<1x8x128xf32>
    %386 = vector.shape_cast %385 : vector<1x8x128xf32> to vector<8x128xf32>
    %c0_272 = arith.constant 0 : index
    %c384_273 = arith.constant 384 : index
    %387 = vector.load %arg4[%c0_272, %c384_273] : memref<128x512xf32, #tpu.memory_space<vmem>>, vector<128x128xf32>
    %cst_274 = arith.constant dense<0.000000e+00> : vector<8x128xf32>
    %388 = tpu.matmul %351, %387, %cst_274 {dimension_numbers = #tpu.dot_dimension_numbers<[1], [0], [0], [1], [0, 0, 1, 1], [], []>} : vector<8x128xf32>, vector<128x128xf32>, vector<8x128xf32> -> vector<8x128xf32>
    %389 = arith.addf %386, %388 : vector<8x128xf32>
    %cst_275 = arith.constant 5.000000e-01 : f32
    %390 = vector.broadcast %cst_275 : f32 to vector<8x128xf32>
    %391 = arith.mulf %390, %389 : vector<8x128xf32>
    %392 = math.tanh %391 : vector<8x128xf32>
    %cst_276 = arith.constant 5.000000e-01 : f32
    %393 = vector.broadcast %cst_276 : f32 to vector<8x128xf32>
    %394 = arith.mulf %393, %392 : vector<8x128xf32>
    %cst_277 = arith.constant 5.000000e-01 : f32
    %395 = vector.broadcast %cst_277 : f32 to vector<8x128xf32>
    %396 = arith.addf %394, %395 : vector<8x128xf32>
    %397 = arith.mulf %378, %349 : vector<8x128xf32>
    %398 = arith.mulf %366, %384 : vector<8x128xf32>
    %399 = arith.addf %397, %398 : vector<8x128xf32>
    %400 = math.tanh %399 : vector<8x128xf32>
    %401 = arith.mulf %396, %400 : vector<8x128xf32>
    %c7_278 = arith.constant 7 : index
    %c0_279 = arith.constant 0 : index
    %c0_280 = arith.constant 0 : index
    %402 = vector.load %arg5[%c7_278, %c0_279, %c0_280] : memref<8x8x128xf32, #tpu.memory_space<vmem>>, vector<1x8x128xf32>
    %403 = vector.shape_cast %402 : vector<1x8x128xf32> to vector<8x128xf32>
    %404 = vector.shape_cast %401 : vector<8x128xf32> to vector<1x8x128xf32>
    tpu.vector_store %arg5[%c7_278, %c0_279, %c0_280], %404 {strides = array<i32>} : memref<8x8x128xf32, #tpu.memory_space<vmem>>, vector<1x8x128xf32>,
    %c0_i32_281 = arith.constant 0 : i32
    %405 = arith.cmpi eq, %arg0, %c0_i32_281 : i32
    %406 = arith.extui %405 : i1 to i32
    %c0_i32_282 = arith.constant 0 : i32
    %407 = arith.cmpi ne, %406, %c0_i32_282 : i32
    scf.if %407 {
      %c0_287 = arith.constant 0 : index
      %c0_288 = arith.constant 0 : index
      %410 = vector.load %arg6[%c0_287, %c0_288] : memref<8x128xf32, #tpu.memory_space<vmem>>, vector<8x128xf32>
      tpu.vector_store %arg6[%c0_287, %c0_288], %401 {strides = array<i32>} : memref<8x128xf32, #tpu.memory_space<vmem>>, vector<8x128xf32>,
      %c0_289 = arith.constant 0 : index
      %c0_290 = arith.constant 0 : index
      %411 = vector.load %arg7[%c0_289, %c0_290] : memref<8x128xf32, #tpu.memory_space<vmem>>, vector<8x128xf32>
      tpu.vector_store %arg7[%c0_289, %c0_290], %399 {strides = array<i32>} : memref<8x128xf32, #tpu.memory_space<vmem>>, vector<8x128xf32>,
    } else {
    }
    %c0_283 = arith.constant 0 : index
    %c0_284 = arith.constant 0 : index
    %408 = vector.load %arg8[%c0_283, %c0_284] : memref<8x128xf32, #tpu.memory_space<vmem>>, vector<8x128xf32>
    tpu.vector_store %arg8[%c0_283, %c0_284], %401 {strides = array<i32>} : memref<8x128xf32, #tpu.memory_space<vmem>>, vector<8x128xf32>,
    %c0_285 = arith.constant 0 : index
    %c0_286 = arith.constant 0 : index
    %409 = vector.load %arg9[%c0_285, %c0_286] : memref<8x128xf32, #tpu.memory_space<vmem>>, vector<8x128xf32>
    tpu.vector_store %arg9[%c0_285, %c0_286], %399 {strides = array<i32>} : memref<8x128xf32, #tpu.memory_space<vmem>>, vector<8x128xf32>,
    return
  }
  func.func @transform_0(%arg0: i32) -> (i32, i32, i32) {
    %c0_i32 = arith.constant 0 : i32
    %c0_i32_0 = arith.constant 0 : i32
    %c0_i32_1 = arith.constant 0 : i32
    return %arg0, %c0_i32, %c0_i32_0 : i32, i32, i32
  }
  func.func @transform_1(%arg0: i32) -> (i32, i32) {
    %c0_i32 = arith.constant 0 : i32
    %c0_i32_0 = arith.constant 0 : i32
    %c0_i32_1 = arith.constant 0 : i32
    return %c0_i32, %c0_i32_0 : i32, i32
  }
  func.func @transform_2(%arg0: i32) -> (i32, i32) {
    %c0_i32 = arith.constant 0 : i32
    %c0_i32_0 = arith.constant 0 : i32
    %c0_i32_1 = arith.constant 0 : i32
    return %c0_i32, %c0_i32_0 : i32, i32
  }
  func.func @transform_3(%arg0: i32) -> (i32, i32) {
    %c0_i32 = arith.constant 0 : i32
    %c0_i32_0 = arith.constant 0 : i32
    %c0_i32_1 = arith.constant 0 : i32
    return %c0_i32, %c0_i32_0 : i32, i32
  }
  func.func @transform_4(%arg0: i32) -> (i32, i32, i32) {
    %c0_i32 = arith.constant 0 : i32
    %c0_i32_0 = arith.constant 0 : i32
    %c0_i32_1 = arith.constant 0 : i32
    return %arg0, %c0_i32, %c0_i32_0 : i32, i32, i32
  }
  func.func @transform_5(%arg0: i32) -> (i32, i32) {
    %c0_i32 = arith.constant 0 : i32
    %c0_i32_0 = arith.constant 0 : i32
    %c0_i32_1 = arith.constant 0 : i32
    return %c0_i32, %c0_i32_0 : i32, i32
  }
  func.func @transform_6(%arg0: i32) -> (i32, i32) {
    %c0_i32 = arith.constant 0 : i32
    %c0_i32_0 = arith.constant 0 : i32
    %c0_i32_1 = arith.constant 0 : i32
    return %c0_i32, %c0_i32_0 : i32, i32
  }
}

</mosaic_0001>

<bundles_post_ra>
// kernel: tpu_custom_call.1
= control target key start
LH: loop header
LB: loop body
LE: loop exit
PB: predicated region body
PF: predicated region fallthrough
CT: control target
= control target key end

     0   :  { %12 = vsyncpa [#allocation5], 0  ;;  %s2652_s0 = inlined_call_operand.hbm [shape: f32[8,8,512], index: 0, kind: input, shape index: {}]   ;;  %s2653_s1 = inlined_call_operand.hbm [shape: f32[8,128], index: 1, kind: input, shape index: {}]   ;;  %s2654_s2 = inlined_call_operand.hbm [shape: f32[8,128], index: 2, kind: input, shape index: {}]   ;;  %s2655_s3 = inlined_call_operand.hbm [shape: f32[128,512], index: 3, kind: input, shape index: {}]   ;;  %s2656_s4 = inlined_call_operand.hbm [shape: f32[8,8,128], index: 4, kind: output, shape index: {0}]   ;;  %s2657_s5 = inlined_call_operand.hbm [shape: f32[8,128], index: 5, kind: output, shape index: {1}]   ;;  %s2658_s6 = inlined_call_operand.hbm [shape: f32[8,128], index: 6, kind: output, shape index: {2}]  }
   0x1   :  { %13 = vsyncpa [#allocation8], 0 }
   0x2   :  { %14 = vsyncpa [#allocation11], 0 }
   0x3   :  { %15 = vsyncpa [#allocation6], 0  ;;  %s35_s23 = sshll.u32 %s2653_s1, 4  ;;  %s36_s23 = int_to_ptr.hbm [resolvable:$true] %s35_s23 }
   0x4   :  { %16 = vsyncpa [#allocation14], 0  ;;  %s1801_s24 = smov [#allocation7]   ;;  %s21_s28 = sshll.u32 %s2652_s0, 4  ;;  %s22_s28 = int_to_ptr.hbm [resolvable:$true] %s21_s28 }
   0x5   :  { %s37_s25 = sshll.u32 %s1801_s24, 4  ;;  %s1802_s29 = smov [#allocation4]   ;;  %s38_s25 = int_to_ptr.vmem [resolvable:$true] %s37_s25 }
   0x6   :  { %40 = dma.hbm_to_vmem [thread:$0]  %s36_s23, 128, %s38_s25, [#allocation8]  }
   0x7   :  { %s23_s30 = sshll.u32 %s1802_s29, 4  ;;  %s1803_s7 = smov 512   ;;  %s24_s30 = int_to_ptr.vmem [resolvable:$true] %s23_s30 }
   0x8   :  { %s1804_s8 = smov 32   ;;  %s46_s1 = sshll.u32 %s2654_s2, 4  ;;  %s47_s1 = int_to_ptr.hbm [resolvable:$true] %s46_s1 }
   0x9   :  { %29 = dma.hbm_to_vmem [thread:$0]  %s22_s28, 4096, %s24_s30, [#allocation5], %s1803_s7, %s1803_s7, %s1804_s8  }
   0xa   :  { %s1805_s11 = smov [#allocation9]   ;;  %s56_s0 = sshll.u32 %s2655_s3, 4  ;;  %s57_s0 = int_to_ptr.hbm [resolvable:$true] %s56_s0 }
   0xb   :  { %s48_s12 = sshll.u32 %s1805_s11, 4  ;;  %s1806_s15 = smov [#allocation10]   ;;  %s49_s12 = int_to_ptr.vmem [resolvable:$true] %s48_s12 }
   0xc   :  { %51 = dma.hbm_to_vmem [thread:$0]  %s47_s1, 128, %s49_s12, [#allocation8]  }
   0xd   :  { %s58_s16 = sshll.u32 %s1806_s15, 4  ;;  %s59_s16 = int_to_ptr.vmem [resolvable:$true] %s58_s16 }
   0xe   :  { %64 = dma.hbm_to_vmem [thread:$0]  %s57_s0, 8192, %s59_s16, [#allocation11], %s1803_s7, %s1803_s7, %s1804_s8  }
   0xf   :  { %1791 = dma.done.wait [#allocation5], 4096  }
  0x10   :  { %1792 = vsyncadd [#allocation5], 4294963200 }
  0x11   :  { %1793 = dma.done.wait [#allocation8], 256  }
  0x12   :  { %1794 = vsyncadd [#allocation8], 4294967040 }
  0x13   :  { %1795 = dma.done.wait [#allocation11], 8192  }
  0x14   :  { %1796 = vsyncadd [#allocation11], 4294959104  ;;  %v1859_v0 = vld [vmem:[#allocation10 + $0x1e0] sm:$0xff]  ;;  %v1861_v1 = vld [vmem:[#allocation10 + $0x1e8] sm:$0xff]  ;;  %s1807_s2 = smov [#allocation12]   ;;  %s1486_s19 = sshll.u32 %s2656_s4, 4  ;;  %s1487_s19 = int_to_ptr.hbm [resolvable:$true] %s1486_s19 }
  0x15   :  { %v1863_v2 = vld [vmem:[#allocation10 + $0x1f0] sm:$0xff]  ;;  %108 = vmatpush.msra.mxu0 %v1859_v0  ;;  %150 = vmatpush.msra.mxu1 %v1861_v1  ;;  %v1867_v3 = vld [vmem:[#allocation10 + $0x1c0] sm:$0xff]  ;;  %v1869_v4 = vld [vmem:[#allocation10 + $0x1c8] sm:$0xff]  ;;  %s1484_s3 = sshll.u32 %s1807_s2, 4  ;;  %s1808_s20 = smov [#allocation13]   ;;  %s1485_s3 = int_to_ptr.vmem [resolvable:$true] %s1484_s3 }
  0x16   :  { %v1871_v5 = vld [vmem:[#allocation10 + $0x1d0] sm:$0xff]  ;;  %192 = vmatpush.msra.mxu2 %v1863_v2  ;;  %v1874_v6 = vld [vmem:[#allocation10 + $0x1a0] sm:$0xff]  ;;  %v1876_v7 = vld [vmem:[#allocation10 + $0x1a8] sm:$0xff]  ;;  %s1498_s21 = sshll.u32 %s1808_s20, 4  ;;  %s1500_s24 = sshll.u32 %s2657_s5, 4  ;;  %s1499_s21 = int_to_ptr.vmem [resolvable:$true] %s1498_s21  ;;  %s1501_s24 = int_to_ptr.hbm [resolvable:$true] %s1500_s24 }
  0x17   :  { %109 = vmatpush.msra.mxu0 %v1867_v3  ;;  %151 = vmatpush.msra.mxu1 %v1869_v4  ;;  %v1880_v8 = vld [vmem:[#allocation10 + $0x1b0] sm:$0xff]  ;;  %v1882_v9 = vld [vmem:[#allocation10 + $0x1f8] sm:$0xff]  ;;  %v1886_v10 = vld [vmem:[#allocation10 + $0x180] sm:$0xff]  ;;  %s1809_s25 = smov [#allocation15]   ;;  %s1511_s29 = sshll.u32 %s2658_s6, 4  ;;  %s1512_s29 = int_to_ptr.hbm [resolvable:$true] %s1511_s29 }
  0x18   :  { %193 = vmatpush.msra.mxu2 %v1871_v5  ;;  %231 = vmatpush.msra.mxu3 %v1882_v9  ;;  %v1888_v11 = vld [vmem:[#allocation10 + $0x188] sm:$0xff]  ;;  %v1890_v12 = vld [vmem:[#allocation10 + $0x1d8] sm:$0xff]  ;;  %v1894_v13 = vld [vmem:[#allocation10 + $0x190] sm:$0xff]  ;;  %s1509_s26 = sshll.u32 %s1809_s25, 4  ;;  %s1810_s4 = smov 128   ;;  %s1510_s26 = int_to_ptr.vmem [resolvable:$true] %s1509_s26 }
  0x19   :  { %110 = vmatpush.msra.mxu0 %v1874_v6  ;;  %152 = vmatpush.msra.mxu1 %v1876_v7  ;;  %v1896_v14 = vld [vmem:[#allocation10 + $0x1b8] sm:$0xff]  ;;  %v1900_v15 = vld [vmem:[#allocation10 + $0x160] sm:$0xff]  ;;  %v1902_v16 = vld [vmem:[#allocation10 + $0x168] sm:$0xff]  ;;  %s1811_s30 = smov 8  }
  0x1a   :  { %194 = vmatpush.msra.mxu2 %v1880_v8  ;;  %232 = vmatpush.msra.mxu3 %v1890_v12  ;;  %v1906_v17 = vld [vmem:[#allocation10 + $0x170] sm:$0xff]  ;;  %v1908_v18 = vld [vmem:[#allocation10 + $0x198] sm:$0xff]  ;;  %v1912_v19 = vld [vmem:[#allocation10 + $0x140] sm:$0xff] }
  0x1b   :  { %111 = vmatpush.msra.mxu0 %v1886_v10  ;;  %153 = vmatpush.msra.mxu1 %v1888_v11  ;;  %v1914_v20 = vld [vmem:[#allocation10 + $0x148] sm:$0xff]  ;;  %v1918_v21 = vld [vmem:[#allocation10 + $0x150] sm:$0xff]  ;;  %v1920_v22 = vld [vmem:[#allocation10 + $0x178] sm:$0xff] }
  0x1c   :  { %195 = vmatpush.msra.mxu2 %v1894_v13  ;;  %233 = vmatpush.msra.mxu3 %v1896_v14  ;;  %v1924_v23 = vld [vmem:[#allocation10 + $0x120] sm:$0xff]  ;;  %v1926_v24 = vld [vmem:[#allocation10 + $0x128] sm:$0xff]  ;;  %v1930_v25 = vld [vmem:[#allocation10 + $0x130] sm:$0xff] }
  0x1d   :  { %112 = vmatpush.msra.mxu0 %v1900_v15  ;;  %154 = vmatpush.msra.mxu1 %v1902_v16  ;;  %v1932_v26 = vld [vmem:[#allocation10 + $0x158] sm:$0xff]  ;;  %v1936_v27 = vld [vmem:[#allocation10 + $0x100] sm:$0xff]  ;;  %v1938_v28 = vld [vmem:[#allocation10 + $0x108] sm:$0xff] }
  0x1e   :  { %196 = vmatpush.msra.mxu2 %v1906_v17  ;;  %234 = vmatpush.msra.mxu3 %v1908_v18  ;;  %v1942_v29 = vld [vmem:[#allocation10 + $0x110] sm:$0xff]  ;;  %v1944_v30 = vld [vmem:[#allocation10 + $0x138] sm:$0xff]  ;;  %v1948_v31 = vld [vmem:[#allocation10 + $0xe0] sm:$0xff] }
  0x1f   :  { %113 = vmatpush.msra.mxu0 %v1912_v19  ;;  %155 = vmatpush.msra.mxu1 %v1914_v20  ;;  %v1950_v32 = vld [vmem:[#allocation10 + $0xe8] sm:$0xff]  ;;  %v1954_v33 = vld [vmem:[#allocation10 + $0xf0] sm:$0xff]  ;;  %v1956_v34 = vld [vmem:[#allocation10 + $0x118] sm:$0xff] }
  0x20   :  { %197 = vmatpush.msra.mxu2 %v1918_v21  ;;  %235 = vmatpush.msra.mxu3 %v1920_v22  ;;  %v1960_v35 = vld [vmem:[#allocation10 + $0xc0] sm:$0xff]  ;;  %v1962_v36 = vld [vmem:[#allocation10 + $0xc8] sm:$0xff]  ;;  %v1966_v37 = vld [vmem:[#allocation10 + $0xd0] sm:$0xff] }
  0x21   :  { %114 = vmatpush.msra.mxu0 %v1924_v23  ;;  %156 = vmatpush.msra.mxu1 %v1926_v24  ;;  %v1968_v38 = vld [vmem:[#allocation10 + $0xf8] sm:$0xff]  ;;  %v1972_v39 = vld [vmem:[#allocation10 + $0xa0] sm:$0xff]  ;;  %v1974_v40 = vld [vmem:[#allocation10 + $0xa8] sm:$0xff] }
  0x22   :  { %198 = vmatpush.msra.mxu2 %v1930_v25  ;;  %236 = vmatpush.msra.mxu3 %v1932_v26  ;;  %v1978_v41 = vld [vmem:[#allocation10 + $0xb0] sm:$0xff]  ;;  %v1980_v42 = vld [vmem:[#allocation10 + $0xd8] sm:$0xff]  ;;  %v1984_v43 = vld [vmem:[#allocation10 + $0x80] sm:$0xff] }
  0x23   :  { %115 = vmatpush.msra.mxu0 %v1936_v27  ;;  %157 = vmatpush.msra.mxu1 %v1938_v28  ;;  %2721 = vst [vmem:[#allocation21_spill] sm:$0xff] %v1984_v43  ;;  %v1986_v44 = vld [vmem:[#allocation10 + $0x88] sm:$0xff]  ;;  %v1990_v45 = vld [vmem:[#allocation10 + $0x90] sm:$0xff]  ;;  %v1992_v46 = vld [vmem:[#allocation10 + $0xb8] sm:$0xff] }
  0x24   :  { %199 = vmatpush.msra.mxu2 %v1942_v29  ;;  %237 = vmatpush.msra.mxu3 %v1944_v30  ;;  %2722 = vst [vmem:[#allocation22_spill] sm:$0xff] %v1986_v44  ;;  %v1996_v47 = vld [vmem:[#allocation10 + $0x60] sm:$0xff]  ;;  %v1998_v48 = vld [vmem:[#allocation10 + $0x68] sm:$0xff]  ;;  %v2002_v49 = vld [vmem:[#allocation10 + $0x70] sm:$0xff] }
  0x25   :  { %116 = vmatpush.msra.mxu0 %v1948_v31  ;;  %158 = vmatpush.msra.mxu1 %v1950_v32  ;;  %2723 = vst [vmem:[#allocation23_spill] sm:$0xff] %v1990_v45  ;;  %v2004_v50 = vld [vmem:[#allocation10 + $0x98] sm:$0xff]  ;;  %v2008_v51 = vld [vmem:[#allocation10 + $0x40] sm:$0xff]  ;;  %v2010_v52 = vld [vmem:[#allocation10 + $0x48] sm:$0xff] }
  0x26   :  { %200 = vmatpush.msra.mxu2 %v1954_v33  ;;  %238 = vmatpush.msra.mxu3 %v1956_v34  ;;  %2724 = vst [vmem:[#allocation24_spill] sm:$0xff] %v1996_v47  ;;  %v2014_v53 = vld [vmem:[#allocation10 + $0x50] sm:$0xff]  ;;  %v2016_v54 = vld [vmem:[#allocation10 + $0x78] sm:$0xff]  ;;  %v2020_v55 = vld [vmem:[#allocation10 + $0x20] sm:$0xff] }
  0x27   :  { %117 = vmatpush.msra.mxu0 %v1960_v35  ;;  %159 = vmatpush.msra.mxu1 %v1962_v36  ;;  %2725 = vst [vmem:[#allocation25_spill] sm:$0xff] %v1998_v48  ;;  %v2022_v56 = vld [vmem:[#allocation10 + $0x28] sm:$0xff]  ;;  %v2026_v57 = vld [vmem:[#allocation10 + $0x30] sm:$0xff]  ;;  %v2028_v58 = vld [vmem:[#allocation10 + $0x58] sm:$0xff] }
  0x28   :  { %201 = vmatpush.msra.mxu2 %v1966_v37  ;;  %239 = vmatpush.msra.mxu3 %v1968_v38  ;;  %2726 = vst [vmem:[#allocation26_spill] sm:$0xff] %v2002_v49  ;;  %v2032_v59 = vld [vmem:[#allocation10] sm:$0xff]  ;;  %v2034_v60 = vld [vmem:[#allocation10 + $0x8] sm:$0xff]  ;;  %v2038_v61 = vld [vmem:[#allocation10 + $0x10] sm:$0xff] }
  0x29   :  { %118 = vmatpush.msra.mxu0 %v1972_v39  ;;  %160 = vmatpush.msra.mxu1 %v1974_v40  ;;  %2727 = vst [vmem:[#allocation27_spill] sm:$0xff] %v2004_v50  ;;  %v85_v62 = vld [vmem:[#allocation7] sm:$0xff]  ;;  %v2044_v63 = vld [vmem:[#allocation10 + $0x38] sm:$0xff] }
  0x2a   :  { %202 = vmatpush.msra.mxu2 %v1978_v41  ;;  %240 = vmatpush.msra.mxu3 %v1980_v42  ;;  %2728 = vst [vmem:[#allocation28_spill] sm:$0xff] %v2008_v51 }
  0x2b   :  { %119 = vmatpush.msra.mxu0 %v1984_v43  ;;  %161 = vmatpush.msra.mxu1 %v1986_v44  ;;  %2729 = vst [vmem:[#allocation29_spill] sm:$0xff] %v2010_v52 }
  0x2c   :  { %203 = vmatpush.msra.mxu2 %v1990_v45  ;;  %241 = vmatpush.msra.mxu3 %v1992_v46  ;;  %2730 = vst [vmem:[#allocation30_spill] sm:$0xff] %v2014_v53 }
  0x2d   :  { %120 = vmatpush.msra.mxu0 %v1996_v47  ;;  %162 = vmatpush.msra.mxu1 %v1998_v48  ;;  %2731 = vst [vmem:[#allocation31_spill] sm:$0xff] %v2016_v54 }
  0x2e   :  { %204 = vmatpush.msra.mxu2 %v2002_v49  ;;  %242 = vmatpush.msra.mxu3 %v2004_v50  ;;  %2732 = vst [vmem:[#allocation32_spill] sm:$0xff] %v2020_v55 }
  0x2f   :  { %2733 = vst [vmem:[#allocation33_spill] sm:$0xff] %v2022_v56  ;;  %121 = vmatpush.msra.mxu0 %v2008_v51  ;;  %163 = vmatpush.msra.mxu1 %v2010_v52 }
  0x30   :  { %2734 = vst [vmem:[#allocation34_spill] sm:$0xff] %v2026_v57  ;;  %205 = vmatpush.msra.mxu2 %v2014_v53  ;;  %243 = vmatpush.msra.mxu3 %v2016_v54 }
  0x31   :  { %2735 = vst [vmem:[#allocation35_spill] sm:$0xff] %v2028_v58  ;;  %122 = vmatpush.msra.mxu0 %v2020_v55  ;;  %164 = vmatpush.msra.mxu1 %v2022_v56  ;;  %v2047_v55 = vld [vmem:[#allocation10 + $0x18] sm:$0xff] }
  0x32   :  { %2736 = vst [vmem:[#allocation36_spill] sm:$0xff] %v2032_v59  ;;  %206 = vmatpush.msra.mxu2 %v2026_v57  ;;  %244 = vmatpush.msra.mxu3 %v2028_v58 }
  0x33   :  { %2737 = vst [vmem:[#allocation37_spill] sm:$0xff] %v2034_v60  ;;  %123 = vmatpush.msra.mxu0 %v2032_v59  ;;  %165 = vmatpush.msra.mxu1 %v2034_v60 }
  0x34   :  { %2738 = vst [vmem:[#allocation38_spill] sm:$0xff] %v2038_v61  ;;  %207 = vmatpush.msra.mxu2 %v2038_v61  ;;  %124 = vmatmul.f32.vlgmr.msra.gmra.mxu0 %v85_v62 }
  0x35   :  { %2739 = vst [vmem:[#allocation39_spill] sm:$0xff] %v2044_v63  ;;  %166 = vmatmul.f32.vlgmr.msra.gmra.mxu1 %v85_v62  ;;  %208 = vmatmul.f32.vlgmr.msra.gmra.mxu2 %v85_v62 }
  0x36   :  { %2740 = vst [vmem:[#allocation40_spill] sm:$0xff] %v2047_v55  ;;  %245 = vmatpush.msra.mxu3 %v2044_v63  ;;  %280 = vmatpush.msrb.mxu0 %v1859_v0 }
  0x37   :  { %322 = vmatpush.msrb.mxu1 %v1861_v1  ;;  %364 = vmatpush.msrb.mxu2 %v1863_v2 }
  0x38   :  { %246 = vmatpush.msra.mxu3 %v2047_v55  ;;  %281 = vmatpush.msrb.mxu0 %v1867_v3 }
  0x39   :  { %247 = vmatmul.f32.vlgmr.msra.gmra.mxu3 %v85_v62  ;;  %323 = vmatpush.msrb.mxu1 %v1869_v4  ;;  %v2741_v62 = vld [vmem:[#allocation32_spill] sm:$0xff] }
  0x3a   :  { %403 = vmatpush.msrb.mxu3 %v1882_v9  ;;  %365 = vmatpush.msrb.mxu2 %v1871_v5 }
  0x3b   :  { %282 = vmatpush.msrb.mxu0 %v1874_v6  ;;  %324 = vmatpush.msrb.mxu1 %v1876_v7 }
  0x3c   :  { %404 = vmatpush.msrb.mxu3 %v1890_v12  ;;  %366 = vmatpush.msrb.mxu2 %v1880_v8 }
  0x3d   :  { %283 = vmatpush.msrb.mxu0 %v1886_v10  ;;  %325 = vmatpush.msrb.mxu1 %v1888_v11 }
  0x3e   :  { %405 = vmatpush.msrb.mxu3 %v1896_v14  ;;  %367 = vmatpush.msrb.mxu2 %v1894_v13 }
  0x3f   :  { %284 = vmatpush.msrb.mxu0 %v1900_v15  ;;  %326 = vmatpush.msrb.mxu1 %v1902_v16 }
  0x40   :  { %406 = vmatpush.msrb.mxu3 %v1908_v18  ;;  %368 = vmatpush.msrb.mxu2 %v1906_v17 }
  0x41   :  { %285 = vmatpush.msrb.mxu0 %v1912_v19  ;;  %327 = vmatpush.msrb.mxu1 %v1914_v20 }
  0x42   :  { %407 = vmatpush.msrb.mxu3 %v1920_v22  ;;  %369 = vmatpush.msrb.mxu2 %v1918_v21 }
  0x43   :  { %286 = vmatpush.msrb.mxu0 %v1924_v23  ;;  %328 = vmatpush.msrb.mxu1 %v1926_v24 }
  0x44   :  { %408 = vmatpush.msrb.mxu3 %v1932_v26  ;;  %370 = vmatpush.msrb.mxu2 %v1930_v25 }
  0x45   :  { %287 = vmatpush.msrb.mxu0 %v1936_v27  ;;  %329 = vmatpush.msrb.mxu1 %v1938_v28 }
  0x46   :  { %409 = vmatpush.msrb.mxu3 %v1944_v30  ;;  %371 = vmatpush.msrb.mxu2 %v1942_v29 }
  0x47   :  { %288 = vmatpush.msrb.mxu0 %v1948_v31  ;;  %330 = vmatpush.msrb.mxu1 %v1950_v32 }
  0x48   :  { %410 = vmatpush.msrb.mxu3 %v1956_v34  ;;  %372 = vmatpush.msrb.mxu2 %v1954_v33 }
  0x49   :  { %289 = vmatpush.msrb.mxu0 %v1960_v35  ;;  %331 = vmatpush.msrb.mxu1 %v1962_v36 }
  0x4a   :  { %411 = vmatpush.msrb.mxu3 %v1968_v38  ;;  %373 = vmatpush.msrb.mxu2 %v1966_v37 }
  0x4b   :  { %290 = vmatpush.msrb.mxu0 %v1972_v39  ;;  %332 = vmatpush.msrb.mxu1 %v1974_v40 }
  0x4c   :  { %412 = vmatpush.msrb.mxu3 %v1980_v42  ;;  %374 = vmatpush.msrb.mxu2 %v1978_v41 }
  0x4d   :  { %291 = vmatpush.msrb.mxu0 %v1984_v43  ;;  %333 = vmatpush.msrb.mxu1 %v1986_v44 }
  0x4e   :  { %413 = vmatpush.msrb.mxu3 %v1992_v46  ;;  %375 = vmatpush.msrb.mxu2 %v1990_v45 }
  0x4f   :  { %292 = vmatpush.msrb.mxu0 %v1996_v47  ;;  %334 = vmatpush.msrb.mxu1 %v1998_v48 }
  0x50   :  { %414 = vmatpush.msrb.mxu3 %v2004_v50  ;;  %376 = vmatpush.msrb.mxu2 %v2002_v49 }
  0x51   :  { %293 = vmatpush.msrb.mxu0 %v2008_v51  ;;  %335 = vmatpush.msrb.mxu1 %v2010_v52 }
  0x52   :  { %415 = vmatpush.msrb.mxu3 %v2016_v54  ;;  %377 = vmatpush.msrb.mxu2 %v2014_v53 }
  0x53   :  { %294 = vmatpush.msrb.mxu0 %v2741_v62  ;;  %336 = vmatpush.msrb.mxu1 %v2022_v56 }
  0x54   :  { %416 = vmatpush.msrb.mxu3 %v2028_v58  ;;  %378 = vmatpush.msrb.mxu2 %v2026_v57 }
  0x55   :  { %295 = vmatpush.msrb.mxu0 %v2032_v59  ;;  %337 = vmatpush.msrb.mxu1 %v2034_v60 }
  0x56   :  { %417 = vmatpush.msrb.mxu3 %v2044_v63  ;;  %379 = vmatpush.msrb.mxu2 %v2038_v61 }
  0x57   :  { %453 = vmatpush.msra.mxu0 %v1859_v0  ;;  %495 = vmatpush.msra.mxu1 %v1861_v1 }
  0x58   :  { %418 = vmatpush.msrb.mxu3 %v2047_v55  ;;  %537 = vmatpush.msra.mxu2 %v1863_v2 }
  0x59   :  { %454 = vmatpush.msra.mxu0 %v1867_v3  ;;  %496 = vmatpush.msra.mxu1 %v1869_v4 }
  0x5a   :  { %576 = vmatpush.msra.mxu3 %v1882_v9  ;;  %538 = vmatpush.msra.mxu2 %v1871_v5 }
  0x5b   :  { %455 = vmatpush.msra.mxu0 %v1874_v6  ;;  %497 = vmatpush.msra.mxu1 %v1876_v7 }
  0x5c   :  { %577 = vmatpush.msra.mxu3 %v1890_v12  ;;  %539 = vmatpush.msra.mxu2 %v1880_v8 }
  0x5d   :  { %456 = vmatpush.msra.mxu0 %v1886_v10  ;;  %498 = vmatpush.msra.mxu1 %v1888_v11 }
  0x5e   :  { %578 = vmatpush.msra.mxu3 %v1896_v14  ;;  %540 = vmatpush.msra.mxu2 %v1894_v13 }
  0x5f   :  { %457 = vmatpush.msra.mxu0 %v1900_v15  ;;  %499 = vmatpush.msra.mxu1 %v1902_v16 }
  0x60   :  { %579 = vmatpush.msra.mxu3 %v1908_v18  ;;  %541 = vmatpush.msra.mxu2 %v1906_v17 }
  0x61   :  { %458 = vmatpush.msra.mxu0 %v1912_v19  ;;  %500 = vmatpush.msra.mxu1 %v1914_v20 }
  0x62   :  { %580 = vmatpush.msra.mxu3 %v1920_v22  ;;  %542 = vmatpush.msra.mxu2 %v1918_v21 }
  0x63   :  { %459 = vmatpush.msra.mxu0 %v1924_v23  ;;  %501 = vmatpush.msra.mxu1 %v1926_v24 }
  0x64   :  { %581 = vmatpush.msra.mxu3 %v1932_v26  ;;  %543 = vmatpush.msra.mxu2 %v1930_v25 }
  0x65   :  { %460 = vmatpush.msra.mxu0 %v1936_v27  ;;  %502 = vmatpush.msra.mxu1 %v1938_v28 }
  0x66   :  { %582 = vmatpush.msra.mxu3 %v1944_v30  ;;  %544 = vmatpush.msra.mxu2 %v1942_v29 }
  0x67   :  { %461 = vmatpush.msra.mxu0 %v1948_v31  ;;  %503 = vmatpush.msra.mxu1 %v1950_v32 }
  0x68   :  { %583 = vmatpush.msra.mxu3 %v1956_v34  ;;  %545 = vmatpush.msra.mxu2 %v1954_v33 }
  0x69   :  { %462 = vmatpush.msra.mxu0 %v1960_v35  ;;  %504 = vmatpush.msra.mxu1 %v1962_v36 }
  0x6a   :  { %584 = vmatpush.msra.mxu3 %v1968_v38  ;;  %546 = vmatpush.msra.mxu2 %v1966_v37 }
  0x6b   :  { %463 = vmatpush.msra.mxu0 %v1972_v39  ;;  %505 = vmatpush.msra.mxu1 %v1974_v40 }
  0x6c   :  { %585 = vmatpush.msra.mxu3 %v1980_v42  ;;  %547 = vmatpush.msra.mxu2 %v1978_v41 }
  0x6d   :  { %464 = vmatpush.msra.mxu0 %v1984_v43  ;;  %506 = vmatpush.msra.mxu1 %v1986_v44  ;;  %v87_v43 = vld [vmem:[#allocation9] sm:$0xff] }
  0x6e   :  { %586 = vmatpush.msra.mxu3 %v1992_v46  ;;  %548 = vmatpush.msra.mxu2 %v1990_v45 }
  0x6f   :  { %465 = vmatpush.msra.mxu0 %v1996_v47  ;;  %507 = vmatpush.msra.mxu1 %v1998_v48 }
  0x70   :  { %587 = vmatpush.msra.mxu3 %v2004_v50  ;;  %549 = vmatpush.msra.mxu2 %v2002_v49 }
  0x71   :  { %466 = vmatpush.msra.mxu0 %v2008_v51  ;;  %508 = vmatpush.msra.mxu1 %v2010_v52  ;;  %v91_v52 = vld [vmem:[#allocation4] sm:$0xff] }
  0x72   :  { %588 = vmatpush.msra.mxu3 %v2016_v54  ;;  %550 = vmatpush.msra.mxu2 %v2014_v53  ;;  %v133_v53 = vld [vmem:[#allocation4 + $0x8] sm:$0xff] }
  0x73   :  { %467 = vmatpush.msra.mxu0 %v2741_v62  ;;  %509 = vmatpush.msra.mxu1 %v2022_v56 }
  0x74   :  { %589 = vmatpush.msra.mxu3 %v2028_v58  ;;  %551 = vmatpush.msra.mxu2 %v2026_v57  ;;  %v175_v57 = vld [vmem:[#allocation4 + $0x10] sm:$0xff] }
  0x75   :  { %468 = vmatpush.msra.mxu0 %v2032_v59  ;;  %510 = vmatpush.msra.mxu1 %v2034_v60  ;;  %v214_v59 = vld [vmem:[#allocation4 + $0x18] sm:$0xff] }
  0x76   :  { %590 = vmatpush.msra.mxu3 %v2044_v63  ;;  %552 = vmatpush.msra.mxu2 %v2038_v61 }
  0x78   :  { %591 = vmatpush.msra.mxu3 %v2047_v55 }
  0xb1   :  { %v125_v51 = vpop.f32.mrf.mxu0 }
  0xb2   :  { %v128_v58 = vadd.f32 %v125_v51, %v91_v52  ;;  %v167_v54 = vpop.f32.mrf.mxu1 }
  0xb3   :  { %v170_v62 = vadd.f32 %v167_v54, %v133_v53 }
  0xb4   :  { %v129_v49 = vmul.f32 0.5, %v128_v58 }
  0xb5   :  { %v171_v56 = vmul.f32 0.5, %v170_v62 }
  0xb6   :  { %1543 = vtanh.f32 %v129_v49 }
  0xb7   :  { %1545 = vtanh.f32 %v171_v56 }
  0xb8   :  { %v209_v63 = vpop.f32.mrf.mxu2 }
  0xb9   :  { %v212_v48 = vadd.f32 %v209_v63, %v175_v57 }
  0xbb   :  { %1547 = vtanh.f32 %v212_v48 }
  0xbc   :  { %v1544_v60 = vpop.eup %1543  ;;  %v248_v47 = vpop.f32.mrf.mxu3 }
  0xbd   :  { %v1546_v61 = vpop.eup %1545  ;;  %v131_v50 = vmul.f32 0.5, %v1544_v60  ;;  %v251_v55 = vadd.f32 %v248_v47, %v214_v59  ;;  %v436_v59 = vld [vmem:[#allocation4 + $0x40] sm:$0xff]  ;;  %v478_v60 = vld [vmem:[#allocation4 + $0x48] sm:$0xff] }
  0xbe   :  { %v173_v45 = vmul.f32 0.5, %v1546_v61  ;;  %v2247_v61 = vld [vmem:[#allocation10 + $0x1e0] sm:$0xff] }
  0xbf   :  { %v132_v44 = vadd.f32 0.5, %v131_v50  ;;  %v252_v51 = vmul.f32 0.5, %v251_v55 }
  0xc0   :  { %v174_v52 = vadd.f32 0.5, %v173_v45 }
  0xc1   :  { %v1548_v53 = vpop.eup %1547  ;;  %1549 = vtanh.f32 %v252_v51  ;;  %v2249_v51 = vld [vmem:[#allocation10 + $0x1e8] sm:$0xff] }
  0xc2   :  { %v256_v54 = vmul.f32 %v174_v52, %v87_v43  ;;  %v257_v49 = vmul.f32 %v1548_v53, %v132_v44  ;;  %v2251_v52 = vld [vmem:[#allocation10 + $0x1f0] sm:$0xff] }
  0xc4   :  { %v2179_v58 = vadd.f32 %v257_v49, %v256_v54  ;;  %v2255_v49 = vld [vmem:[#allocation10 + $0x1f8] sm:$0xff] }
  0xc6   :  { %1551 = vtanh.f32 %v2179_v58 }
  0xc7   :  { %v1550_v56 = vpop.eup %1549 }
  0xc8   :  { %v254_v48 = vmul.f32 0.5, %v1550_v56 }
  0xca   :  { %v255_v57 = vadd.f32 0.5, %v254_v48 }
  0xcc   :  { %v1552_v63 = vpop.eup %1551 }
  0xcd   :  { %v260_v62 = vmul.f32 %v1552_v63, %v255_v57  ;;  %v520_v63 = vld [vmem:[#allocation4 + $0x50] sm:$0xff] }
  0xcf   :  { %261 = vst [vmem:[#allocation12] sm:$0xff] %v260_v62  ;;  %296 = vmatmul.f32.vlgmr.msrb.gmra.mxu0 %v260_v62  ;;  %338 = vmatmul.f32.vlgmr.msrb.gmra.mxu1 %v260_v62 }
  0xd0   :  { %380 = vmatmul.f32.vlgmr.msrb.gmra.mxu2 %v260_v62  ;;  %419 = vmatmul.f32.vlgmr.msrb.gmra.mxu3 %v260_v62  ;;  %v559_v62 = vld [vmem:[#allocation4 + $0x58] sm:$0xff] }
  0xd1   :  { %626 = vmatpush.msrb.mxu0 %v1859_v0  ;;  %668 = vmatpush.msrb.mxu1 %v1861_v1  ;;  %v2742_v0 = vld [vmem:[#allocation21_spill] sm:$0xff]  ;;  %v2743_v1 = vld [vmem:[#allocation22_spill] sm:$0xff] }
  0xd2   :  { %710 = vmatpush.msrb.mxu2 %v1863_v2  ;;  %749 = vmatpush.msrb.mxu3 %v1882_v9  ;;  %v2744_v2 = vld [vmem:[#allocation23_spill] sm:$0xff]  ;;  %v2751_v9 = vld [vmem:[#allocation29_spill] sm:$0xff]  ;;  %2762 = vst [vmem:[#allocation21_spill] sm:$0xff] %v2247_v61 }
  0xd3   :  { %627 = vmatpush.msrb.mxu0 %v1867_v3  ;;  %669 = vmatpush.msrb.mxu1 %v1869_v4  ;;  %v2745_v3 = vld [vmem:[#allocation27_spill] sm:$0xff]  ;;  %v2746_v4 = vld [vmem:[#allocation24_spill] sm:$0xff] }
  0xd4   :  { %711 = vmatpush.msrb.mxu2 %v1871_v5  ;;  %750 = vmatpush.msrb.mxu3 %v1890_v12  ;;  %v2747_v5 = vld [vmem:[#allocation25_spill] sm:$0xff]  ;;  %v2754_v12 = vld [vmem:[#allocation32_spill] sm:$0xff] }
  0xd5   :  { %628 = vmatpush.msrb.mxu0 %v1874_v6  ;;  %670 = vmatpush.msrb.mxu1 %v1876_v7  ;;  %v2748_v6 = vld [vmem:[#allocation26_spill] sm:$0xff]  ;;  %v2749_v7 = vld [vmem:[#allocation31_spill] sm:$0xff] }
  0xd6   :  { %712 = vmatpush.msrb.mxu2 %v1880_v8  ;;  %751 = vmatpush.msrb.mxu3 %v1896_v14  ;;  %v2750_v8 = vld [vmem:[#allocation28_spill] sm:$0xff]  ;;  %v2756_v14 = vld [vmem:[#allocation34_spill] sm:$0xff] }
  0xd7   :  { %629 = vmatpush.msrb.mxu0 %v1886_v10  ;;  %671 = vmatpush.msrb.mxu1 %v1888_v11  ;;  %v2752_v10 = vld [vmem:[#allocation30_spill] sm:$0xff]  ;;  %v2753_v11 = vld [vmem:[#allocation35_spill] sm:$0xff] }
  0xd8   :  { %713 = vmatpush.msrb.mxu2 %v1894_v13  ;;  %752 = vmatpush.msrb.mxu3 %v1908_v18  ;;  %v2755_v13 = vld [vmem:[#allocation33_spill] sm:$0xff]  ;;  %v2760_v18 = vld [vmem:[#allocation38_spill] sm:$0xff] }
  0xd9   :  { %630 = vmatpush.msrb.mxu0 %v1900_v15  ;;  %672 = vmatpush.msrb.mxu1 %v1902_v16  ;;  %v2757_v15 = vld [vmem:[#allocation39_spill] sm:$0xff]  ;;  %v2758_v16 = vld [vmem:[#allocation36_spill] sm:$0xff] }
  0xda   :  { %714 = vmatpush.msrb.mxu2 %v1906_v17  ;;  %753 = vmatpush.msrb.mxu3 %v1920_v22  ;;  %v2759_v17 = vld [vmem:[#allocation37_spill] sm:$0xff] }
  0xdb   :  { %631 = vmatpush.msrb.mxu0 %v1912_v19  ;;  %673 = vmatpush.msrb.mxu1 %v1914_v20  ;;  %v2761_v19 = vld [vmem:[#allocation40_spill] sm:$0xff]  ;;  %v263_v20 = vld [vmem:[#allocation4 + $0x20] sm:$0xff] }
  0xdc   :  { %715 = vmatpush.msrb.mxu2 %v1918_v21  ;;  %754 = vmatpush.msrb.mxu3 %v1932_v26  ;;  %v305_v21 = vld [vmem:[#allocation4 + $0x28] sm:$0xff] }
  0xdd   :  { %632 = vmatpush.msrb.mxu0 %v1924_v23  ;;  %674 = vmatpush.msrb.mxu1 %v1926_v24 }
  0xde   :  { %716 = vmatpush.msrb.mxu2 %v1930_v25  ;;  %755 = vmatpush.msrb.mxu3 %v1944_v30 }
  0xdf   :  { %633 = vmatpush.msrb.mxu0 %v1936_v27  ;;  %675 = vmatpush.msrb.mxu1 %v1938_v28  ;;  %v347_v28 = vld [vmem:[#allocation4 + $0x30] sm:$0xff] }
  0xe0   :  { %717 = vmatpush.msrb.mxu2 %v1942_v29  ;;  %756 = vmatpush.msrb.mxu3 %v1956_v34  ;;  %v386_v29 = vld [vmem:[#allocation4 + $0x38] sm:$0xff] }
  0xe1   :  { %634 = vmatpush.msrb.mxu0 %v1948_v31  ;;  %676 = vmatpush.msrb.mxu1 %v1950_v32 }
  0xe2   :  { %718 = vmatpush.msrb.mxu2 %v1954_v33  ;;  %757 = vmatpush.msrb.mxu3 %v1968_v38 }
  0xe3   :  { %635 = vmatpush.msrb.mxu0 %v1960_v35  ;;  %677 = vmatpush.msrb.mxu1 %v1962_v36 }
  0xe4   :  { %719 = vmatpush.msrb.mxu2 %v1966_v37  ;;  %758 = vmatpush.msrb.mxu3 %v1980_v42 }
  0xe5   :  { %636 = vmatpush.msrb.mxu0 %v1972_v39  ;;  %678 = vmatpush.msrb.mxu1 %v1974_v40 }
  0xe6   :  { %720 = vmatpush.msrb.mxu2 %v1978_v41  ;;  %759 = vmatpush.msrb.mxu3 %v1992_v46 }
  0xe7   :  { %637 = vmatpush.msrb.mxu0 %v2742_v0  ;;  %679 = vmatpush.msrb.mxu1 %v2743_v1 }
  0xe8   :  { %721 = vmatpush.msrb.mxu2 %v2744_v2  ;;  %760 = vmatpush.msrb.mxu3 %v2745_v3 }
  0xe9   :  { %638 = vmatpush.msrb.mxu0 %v2746_v4  ;;  %680 = vmatpush.msrb.mxu1 %v2747_v5 }
  0xea   :  { %722 = vmatpush.msrb.mxu2 %v2748_v6  ;;  %761 = vmatpush.msrb.mxu3 %v2749_v7 }
  0xeb   :  { %639 = vmatpush.msrb.mxu0 %v2750_v8  ;;  %681 = vmatpush.msrb.mxu1 %v2751_v9 }
  0xec   :  { %723 = vmatpush.msrb.mxu2 %v2752_v10  ;;  %762 = vmatpush.msrb.mxu3 %v2753_v11 }
  0xed   :  { %640 = vmatpush.msrb.mxu0 %v2754_v12  ;;  %682 = vmatpush.msrb.mxu1 %v2755_v13 }
  0xee   :  { %724 = vmatpush.msrb.mxu2 %v2756_v14  ;;  %763 = vmatpush.msrb.mxu3 %v2757_v15 }
  0xef   :  { %641 = vmatpush.msrb.mxu0 %v2758_v16  ;;  %683 = vmatpush.msrb.mxu1 %v2759_v17 }
  0xf0   :  { %725 = vmatpush.msrb.mxu2 %v2760_v18  ;;  %764 = vmatpush.msrb.mxu3 %v2761_v19 }
 0x14c   :  { %v297_v22 = vpop.f32.mrf.mxu0  ;;  %v339_v23 = vpop.f32.mrf.mxu1 }
 0x14d   :  { %v300_v24 = vadd.f32 %v297_v22, %v263_v20  ;;  %v342_v25 = vadd.f32 %v339_v23, %v305_v21  ;;  %v2262_v20 = vld [vmem:[#allocation10 + $0x1c0] sm:$0xff]  ;;  %v2264_v21 = vld [vmem:[#allocation10 + $0x1c8] sm:$0xff]  ;;  %v2266_v22 = vld [vmem:[#allocation10 + $0x1d0] sm:$0xff] }
 0x14e   :  { %v2270_v23 = vld [vmem:[#allocation10 + $0x1d8] sm:$0xff] }
 0x14f   :  { %v301_v26 = vmul.f32 0.5, %v300_v24  ;;  %v343_v27 = vmul.f32 0.5, %v342_v25  ;;  %v2274_v24 = vld [vmem:[#allocation10 + $0x1a0] sm:$0xff]  ;;  %v2276_v25 = vld [vmem:[#allocation10 + $0x1a8] sm:$0xff] }
 0x151   :  { %1553 = vtanh.f32 %v301_v26  ;;  %v2278_v26 = vld [vmem:[#allocation10 + $0x1b0] sm:$0xff] }
 0x152   :  { %1555 = vtanh.f32 %v343_v27  ;;  %v2282_v27 = vld [vmem:[#allocation10 + $0x1b8] sm:$0xff] }
 0x153   :  { %v381_v30 = vpop.f32.mrf.mxu2  ;;  %v420_v31 = vpop.f32.mrf.mxu3 }
 0x154   :  { %v384_v32 = vadd.f32 %v381_v30, %v347_v28  ;;  %v423_v33 = vadd.f32 %v420_v31, %v386_v29  ;;  %v2286_v28 = vld [vmem:[#allocation10 + $0x180] sm:$0xff]  ;;  %v2288_v29 = vld [vmem:[#allocation10 + $0x188] sm:$0xff]  ;;  %v2290_v30 = vld [vmem:[#allocation10 + $0x190] sm:$0xff] }
 0x155   :  { %v2294_v31 = vld [vmem:[#allocation10 + $0x198] sm:$0xff] }
 0x156   :  { %1557 = vtanh.f32 %v384_v32  ;;  %v424_v34 = vmul.f32 0.5, %v423_v33  ;;  %v2298_v32 = vld [vmem:[#allocation10 + $0x160] sm:$0xff]  ;;  %v2300_v33 = vld [vmem:[#allocation10 + $0x168] sm:$0xff] }
 0x157   :  { %v1554_v35 = vpop.eup %1553 }
 0x158   :  { %v1556_v36 = vpop.eup %1555  ;;  %v303_v37 = vmul.f32 0.5, %v1554_v35  ;;  %1559 = vtanh.f32 %v424_v34  ;;  %v2302_v34 = vld [vmem:[#allocation10 + $0x170] sm:$0xff]  ;;  %v2306_v35 = vld [vmem:[#allocation10 + $0x178] sm:$0xff] }
 0x159   :  { %v345_v38 = vmul.f32 0.5, %v1556_v36  ;;  %v2310_v36 = vld [vmem:[#allocation10 + $0x140] sm:$0xff] }
 0x15a   :  { %v304_v39 = vadd.f32 0.5, %v303_v37  ;;  %v2312_v37 = vld [vmem:[#allocation10 + $0x148] sm:$0xff] }
 0x15b   :  { %v346_v40 = vadd.f32 0.5, %v345_v38  ;;  %v2314_v38 = vld [vmem:[#allocation10 + $0x150] sm:$0xff] }
 0x15c   :  { %v1558_v41 = vpop.eup %1557 }
 0x15d   :  { %v428_v42 = vmul.f32 %v346_v40, %v2179_v58  ;;  %v429_v43 = vmul.f32 %v1558_v41, %v304_v39  ;;  %v2318_v39 = vld [vmem:[#allocation10 + $0x158] sm:$0xff]  ;;  %v2322_v40 = vld [vmem:[#allocation10 + $0x120] sm:$0xff]  ;;  %v2324_v41 = vld [vmem:[#allocation10 + $0x128] sm:$0xff] }
 0x15e   :  { %v1560_v44 = vpop.eup %1559 }
 0x15f   :  { %v430_v45 = vadd.f32 %v429_v43, %v428_v42  ;;  %v426_v46 = vmul.f32 0.5, %v1560_v44  ;;  %v2326_v42 = vld [vmem:[#allocation10 + $0x130] sm:$0xff]  ;;  %v2330_v43 = vld [vmem:[#allocation10 + $0x138] sm:$0xff]  ;;  %v2334_v44 = vld [vmem:[#allocation10 + $0x100] sm:$0xff] }
 0x161   :  { %1561 = vtanh.f32 %v430_v45  ;;  %v427_v47 = vadd.f32 0.5, %v426_v46  ;;  %v2338_v46 = vld [vmem:[#allocation10 + $0x110] sm:$0xff] }
 0x167   :  { %v1562_v50 = vpop.eup %1561 }
 0x168   :  { %v432_v55 = vmul.f32 %v1562_v50, %v427_v47  ;;  %v2342_v47 = vld [vmem:[#allocation10 + $0x118] sm:$0xff]  ;;  %v2346_v50 = vld [vmem:[#allocation10 + $0xe0] sm:$0xff] }
 0x16a   :  { %434 = vst [vmem:[#allocation12 + $0x8] sm:$0xff] %v432_v55  ;;  %469 = vmatmul.f32.vlgmr.msra.gmra.mxu0 %v432_v55  ;;  %511 = vmatmul.f32.vlgmr.msra.gmra.mxu1 %v432_v55 }
 0x16b   :  { %553 = vmatmul.f32.vlgmr.msra.gmra.mxu2 %v432_v55  ;;  %592 = vmatmul.f32.vlgmr.msra.gmra.mxu3 %v432_v55  ;;  %v2348_v55 = vld [vmem:[#allocation10 + $0xe8] sm:$0xff] }
 0x16c   :  { %799 = vmatpush.msra.mxu0 %v2247_v61  ;;  %841 = vmatpush.msra.mxu1 %v2249_v51 }
 0x16d   :  { %883 = vmatpush.msra.mxu2 %v2251_v52  ;;  %922 = vmatpush.msra.mxu3 %v2255_v49 }
 0x16e   :  { %800 = vmatpush.msra.mxu0 %v2262_v20  ;;  %842 = vmatpush.msra.mxu1 %v2264_v21 }
 0x16f   :  { %884 = vmatpush.msra.mxu2 %v2266_v22  ;;  %923 = vmatpush.msra.mxu3 %v2270_v23 }
 0x170   :  { %801 = vmatpush.msra.mxu0 %v2274_v24  ;;  %843 = vmatpush.msra.mxu1 %v2276_v25 }
 0x171   :  { %885 = vmatpush.msra.mxu2 %v2278_v26  ;;  %924 = vmatpush.msra.mxu3 %v2282_v27 }
 0x172   :  { %802 = vmatpush.msra.mxu0 %v2286_v28  ;;  %844 = vmatpush.msra.mxu1 %v2288_v29 }
 0x173   :  { %886 = vmatpush.msra.mxu2 %v2290_v30  ;;  %925 = vmatpush.msra.mxu3 %v2294_v31 }
 0x174   :  { %803 = vmatpush.msra.mxu0 %v2298_v32  ;;  %845 = vmatpush.msra.mxu1 %v2300_v33 }
 0x175   :  { %887 = vmatpush.msra.mxu2 %v2302_v34  ;;  %926 = vmatpush.msra.mxu3 %v2306_v35 }
 0x176   :  { %804 = vmatpush.msra.mxu0 %v2310_v36  ;;  %846 = vmatpush.msra.mxu1 %v2312_v37 }
 0x177   :  { %888 = vmatpush.msra.mxu2 %v2314_v38  ;;  %927 = vmatpush.msra.mxu3 %v2318_v39 }
 0x178   :  { %805 = vmatpush.msra.mxu0 %v2322_v40  ;;  %847 = vmatpush.msra.mxu1 %v2324_v41 }
 0x179   :  { %889 = vmatpush.msra.mxu2 %v2326_v42  ;;  %928 = vmatpush.msra.mxu3 %v2330_v43 }
 0x17a   :  { %806 = vmatpush.msra.mxu0 %v2334_v44 }
 0x17b   :  { %890 = vmatpush.msra.mxu2 %v2338_v46  ;;  %929 = vmatpush.msra.mxu3 %v2342_v47 }
 0x17c   :  { %807 = vmatpush.msra.mxu0 %v2346_v50 }
 0x1e7   :  { %v470_v53 = vpop.f32.mrf.mxu0  ;;  %v512_v54 = vpop.f32.mrf.mxu1 }
 0x1e8   :  { %v473_v58 = vadd.f32 %v470_v53, %v436_v59  ;;  %v515_v56 = vadd.f32 %v512_v54, %v478_v60  ;;  %v2350_v59 = vld [vmem:[#allocation10 + $0xf0] sm:$0xff]  ;;  %v2354_v60 = vld [vmem:[#allocation10 + $0xf8] sm:$0xff]  ;;  %v2358_v53 = vld [vmem:[#allocation10 + $0xc0] sm:$0xff] }
 0x1e9   :  { %891 = vmatpush.msra.mxu2 %v2350_v59  ;;  %930 = vmatpush.msra.mxu3 %v2354_v60  ;;  %v2360_v54 = vld [vmem:[#allocation10 + $0xc8] sm:$0xff] }
 0x1ea   :  { %v474_v48 = vmul.f32 0.5, %v473_v58  ;;  %v516_v57 = vmul.f32 0.5, %v515_v56  ;;  %v2362_v58 = vld [vmem:[#allocation10 + $0xd0] sm:$0xff]  ;;  %808 = vmatpush.msra.mxu0 %v2358_v53  ;;  %v2366_v56 = vld [vmem:[#allocation10 + $0xd8] sm:$0xff] }
 0x1eb   :  { %892 = vmatpush.msra.mxu2 %v2362_v58  ;;  %931 = vmatpush.msra.mxu3 %v2366_v56 }
 0x1ec   :  { %1563 = vtanh.f32 %v474_v48  ;;  %v2370_v48 = vld [vmem:[#allocation10 + $0xa0] sm:$0xff] }
 0x1ed   :  { %1565 = vtanh.f32 %v516_v57  ;;  %v2372_v57 = vld [vmem:[#allocation10 + $0xa8] sm:$0xff]  ;;  %809 = vmatpush.msra.mxu0 %v2370_v48 }
 0x1ee   :  { %v554_v0 = vpop.f32.mrf.mxu2  ;;  %v593_v1 = vpop.f32.mrf.mxu3 }
 0x1ef   :  { %v557_v2 = vadd.f32 %v554_v0, %v520_v63  ;;  %v596_v3 = vadd.f32 %v593_v1, %v559_v62  ;;  %v2374_v63 = vld [vmem:[#allocation10 + $0xb0] sm:$0xff]  ;;  %v2378_v62 = vld [vmem:[#allocation10 + $0xb8] sm:$0xff]  ;;  %v2382_v0 = vld [vmem:[#allocation10 + $0x80] sm:$0xff] }
 0x1f0   :  { %893 = vmatpush.msra.mxu2 %v2374_v63  ;;  %932 = vmatpush.msra.mxu3 %v2378_v62  ;;  %2763 = vst [vmem:[#allocation22_spill] sm:$0xff] %v2382_v0  ;;  %v2384_v1 = vld [vmem:[#allocation10 + $0x88] sm:$0xff] }
 0x1f1   :  { %1567 = vtanh.f32 %v557_v2  ;;  %v597_v4 = vmul.f32 0.5, %v596_v3  ;;  %2764 = vst [vmem:[#allocation23_spill] sm:$0xff] %v2384_v1  ;;  %v2386_v2 = vld [vmem:[#allocation10 + $0x90] sm:$0xff]  ;;  %810 = vmatpush.msra.mxu0 %v2382_v0  ;;  %v2390_v3 = vld [vmem:[#allocation10 + $0x98] sm:$0xff] }
 0x1f2   :  { %v1564_v5 = vpop.eup %1563  ;;  %2765 = vst [vmem:[#allocation27_spill] sm:$0xff] %v2386_v2  ;;  %894 = vmatpush.msra.mxu2 %v2386_v2  ;;  %933 = vmatpush.msra.mxu3 %v2390_v3 }
 0x1f3   :  { %v1566_v6 = vpop.eup %1565  ;;  %v476_v7 = vmul.f32 0.5, %v1564_v5  ;;  %1569 = vtanh.f32 %v597_v4  ;;  %2766 = vst [vmem:[#allocation24_spill] sm:$0xff] %v2390_v3  ;;  %v2394_v4 = vld [vmem:[#allocation10 + $0x60] sm:$0xff]  ;;  %v2396_v5 = vld [vmem:[#allocation10 + $0x68] sm:$0xff] }
 0x1f4   :  { %v518_v8 = vmul.f32 0.5, %v1566_v6  ;;  %2767 = vst [vmem:[#allocation25_spill] sm:$0xff] %v2394_v4  ;;  %v2398_v6 = vld [vmem:[#allocation10 + $0x70] sm:$0xff]  ;;  %811 = vmatpush.msra.mxu0 %v2394_v4 }
 0x1f5   :  { %v477_v9 = vadd.f32 0.5, %v476_v7  ;;  %2768 = vst [vmem:[#allocation26_spill] sm:$0xff] %v2396_v5  ;;  %v2402_v7 = vld [vmem:[#allocation10 + $0x78] sm:$0xff]  ;;  %895 = vmatpush.msra.mxu2 %v2398_v6 }
 0x1f6   :  { %v519_v10 = vadd.f32 0.5, %v518_v8  ;;  %2769 = vst [vmem:[#allocation31_spill] sm:$0xff] %v2398_v6  ;;  %934 = vmatpush.msra.mxu3 %v2402_v7  ;;  %v2406_v8 = vld [vmem:[#allocation10 + $0x40] sm:$0xff] }
 0x1f7   :  { %v1568_v11 = vpop.eup %1567  ;;  %2770 = vst [vmem:[#allocation28_spill] sm:$0xff] %v2402_v7  ;;  %812 = vmatpush.msra.mxu0 %v2406_v8 }
 0x1f8   :  { %v601_v12 = vmul.f32 %v519_v10, %v430_v45  ;;  %v602_v13 = vmul.f32 %v1568_v11, %v477_v9  ;;  %v2336_v45 = vld [vmem:[#allocation10 + $0x108] sm:$0xff]  ;;  %2771 = vst [vmem:[#allocation29_spill] sm:$0xff] %v2406_v8  ;;  %v2410_v10 = vld [vmem:[#allocation10 + $0x50] sm:$0xff]  ;;  %v2414_v11 = vld [vmem:[#allocation10 + $0x58] sm:$0xff] }
 0x1f9   :  { %v1570_v14 = vpop.eup %1569  ;;  %848 = vmatpush.msra.mxu1 %v2336_v45  ;;  %v2408_v9 = vld [vmem:[#allocation10 + $0x48] sm:$0xff]  ;;  %2773 = vst [vmem:[#allocation35_spill] sm:$0xff] %v2410_v10  ;;  %896 = vmatpush.msra.mxu2 %v2410_v10 }
 0x1fa   :  { %v2259_v15 = vadd.f32 %v602_v13, %v601_v12  ;;  %v599_v16 = vmul.f32 0.5, %v1570_v14  ;;  %2772 = vst [vmem:[#allocation30_spill] sm:$0xff] %v2408_v9  ;;  %935 = vmatpush.msra.mxu3 %v2414_v11  ;;  %v2418_v12 = vld [vmem:[#allocation10 + $0x20] sm:$0xff]  ;;  %v2420_v13 = vld [vmem:[#allocation10 + $0x28] sm:$0xff]  ;;  %v2422_v14 = vld [vmem:[#allocation10 + $0x30] sm:$0xff] }
 0x1fb   :  { %849 = vmatpush.msra.mxu1 %v2348_v55  ;;  %2774 = vst [vmem:[#allocation32_spill] sm:$0xff] %v2414_v11  ;;  %813 = vmatpush.msra.mxu0 %v2418_v12  ;;  %v2438_v11 = vld [vmem:[#allocation10 + $0x18] sm:$0xff] }
 0x1fc   :  { %1571 = vtanh.f32 %v2259_v15  ;;  %v600_v17 = vadd.f32 0.5, %v599_v16  ;;  %2775 = vst [vmem:[#allocation33_spill] sm:$0xff] %v2418_v12  ;;  %v2426_v16 = vld [vmem:[#allocation10 + $0x38] sm:$0xff]  ;;  %897 = vmatpush.msra.mxu2 %v2422_v14  ;;  %v609_v12 = vld [vmem:[#allocation4 + $0x60] sm:$0xff] }
 0x1fd   :  { %850 = vmatpush.msra.mxu1 %v2360_v54  ;;  %2776 = vst [vmem:[#allocation34_spill] sm:$0xff] %v2420_v13  ;;  %936 = vmatpush.msra.mxu3 %v2426_v16 }
 0x1fe   :  { %2777 = vst [vmem:[#allocation39_spill] sm:$0xff] %v2422_v14 }
 0x1ff   :  { %851 = vmatpush.msra.mxu1 %v2372_v57  ;;  %2778 = vst [vmem:[#allocation36_spill] sm:$0xff] %v2426_v16  ;;  %937 = vmatpush.msra.mxu3 %v2438_v11 }
 0x200   :  { %2782 = vst [vmem:[#allocation41_spill] sm:$0xff] %v2438_v11 }
 0x201   :  { %852 = vmatpush.msra.mxu1 %v2384_v1 }
 0x202   :  { %v1572_v18 = vpop.eup %1571 }
 0x203   :  { %v605_v19 = vmul.f32 %v1572_v18, %v600_v17  ;;  %853 = vmatpush.msra.mxu1 %v2396_v5  ;;  %v2430_v17 = vld [vmem:[#allocation10] sm:$0xff]  ;;  %v2432_v18 = vld [vmem:[#allocation10 + $0x8] sm:$0xff] }
 0x204   :  { %2779 = vst [vmem:[#allocation37_spill] sm:$0xff] %v2430_v17  ;;  %814 = vmatpush.msra.mxu0 %v2430_v17 }
 0x205   :  { %607 = vst [vmem:[#allocation12 + $0x10] sm:$0xff] %v605_v19  ;;  %642 = vmatmul.f32.vlgmr.msrb.gmra.mxu0 %v605_v19  ;;  %684 = vmatmul.f32.vlgmr.msrb.gmra.mxu1 %v605_v19 }
 0x206   :  { %726 = vmatmul.f32.vlgmr.msrb.gmra.mxu2 %v605_v19  ;;  %765 = vmatmul.f32.vlgmr.msrb.gmra.mxu3 %v605_v19  ;;  %2780 = vst [vmem:[#allocation38_spill] sm:$0xff] %v2432_v18  ;;  %v2434_v19 = vld [vmem:[#allocation10 + $0x10] sm:$0xff] }
 0x207   :  { %854 = vmatpush.msra.mxu1 %v2408_v9  ;;  %2781 = vst [vmem:[#allocation40_spill] sm:$0xff] %v2434_v19  ;;  %898 = vmatpush.msra.mxu2 %v2434_v19 }
 0x208   :  { %972 = vmatpush.msrb.mxu0 %v2247_v61  ;;  %1095 = vmatpush.msrb.mxu3 %v2255_v49 }
 0x209   :  { %855 = vmatpush.msra.mxu1 %v2420_v13  ;;  %v651_v13 = vld [vmem:[#allocation4 + $0x68] sm:$0xff]  ;;  %1056 = vmatpush.msrb.mxu2 %v2251_v52 }
 0x20a   :  { %973 = vmatpush.msrb.mxu0 %v2262_v20  ;;  %1096 = vmatpush.msrb.mxu3 %v2270_v23 }
 0x20b   :  { %856 = vmatpush.msra.mxu1 %v2432_v18  ;;  %1057 = vmatpush.msrb.mxu2 %v2266_v22 }
 0x20c   :  { %974 = vmatpush.msrb.mxu0 %v2274_v24  ;;  %1097 = vmatpush.msrb.mxu3 %v2282_v27 }
 0x20d   :  { %1014 = vmatpush.msrb.mxu1 %v2249_v51  ;;  %1058 = vmatpush.msrb.mxu2 %v2278_v26 }
 0x20e   :  { %975 = vmatpush.msrb.mxu0 %v2286_v28  ;;  %1098 = vmatpush.msrb.mxu3 %v2294_v31 }
 0x20f   :  { %1015 = vmatpush.msrb.mxu1 %v2264_v21  ;;  %1059 = vmatpush.msrb.mxu2 %v2290_v30 }
 0x210   :  { %976 = vmatpush.msrb.mxu0 %v2298_v32  ;;  %1099 = vmatpush.msrb.mxu3 %v2306_v35 }
 0x211   :  { %1016 = vmatpush.msrb.mxu1 %v2276_v25  ;;  %1060 = vmatpush.msrb.mxu2 %v2302_v34 }
 0x212   :  { %977 = vmatpush.msrb.mxu0 %v2310_v36  ;;  %1100 = vmatpush.msrb.mxu3 %v2318_v39 }
 0x213   :  { %1017 = vmatpush.msrb.mxu1 %v2288_v29  ;;  %1061 = vmatpush.msrb.mxu2 %v2314_v38 }
 0x214   :  { %978 = vmatpush.msrb.mxu0 %v2322_v40  ;;  %1101 = vmatpush.msrb.mxu3 %v2330_v43 }
 0x215   :  { %1018 = vmatpush.msrb.mxu1 %v2300_v33  ;;  %1062 = vmatpush.msrb.mxu2 %v2326_v42 }
 0x216   :  { %979 = vmatpush.msrb.mxu0 %v2334_v44  ;;  %1102 = vmatpush.msrb.mxu3 %v2342_v47 }
 0x217   :  { %1019 = vmatpush.msrb.mxu1 %v2312_v37  ;;  %1063 = vmatpush.msrb.mxu2 %v2338_v46 }
 0x218   :  { %980 = vmatpush.msrb.mxu0 %v2346_v50  ;;  %1103 = vmatpush.msrb.mxu3 %v2354_v60 }
 0x219   :  { %1020 = vmatpush.msrb.mxu1 %v2324_v41  ;;  %1064 = vmatpush.msrb.mxu2 %v2350_v59 }
 0x21a   :  { %981 = vmatpush.msrb.mxu0 %v2358_v53  ;;  %1104 = vmatpush.msrb.mxu3 %v2366_v56 }
 0x21b   :  { %1021 = vmatpush.msrb.mxu1 %v2336_v45  ;;  %1065 = vmatpush.msrb.mxu2 %v2362_v58 }
 0x21c   :  { %982 = vmatpush.msrb.mxu0 %v2370_v48  ;;  %1105 = vmatpush.msrb.mxu3 %v2378_v62 }
 0x21d   :  { %1022 = vmatpush.msrb.mxu1 %v2348_v55  ;;  %1066 = vmatpush.msrb.mxu2 %v2374_v63 }
 0x21e   :  { %983 = vmatpush.msrb.mxu0 %v2382_v0  ;;  %1106 = vmatpush.msrb.mxu3 %v2390_v3 }
 0x21f   :  { %1023 = vmatpush.msrb.mxu1 %v2360_v54  ;;  %1067 = vmatpush.msrb.mxu2 %v2386_v2 }
 0x220   :  { %984 = vmatpush.msrb.mxu0 %v2394_v4  ;;  %1107 = vmatpush.msrb.mxu3 %v2402_v7  ;;  %v2789_v7 = vld [vmem:[#allocation37_spill] sm:$0xff] }
 0x221   :  { %1024 = vmatpush.msrb.mxu1 %v2372_v57  ;;  %1068 = vmatpush.msrb.mxu2 %v2398_v6 }
 0x222   :  { %985 = vmatpush.msrb.mxu0 %v2406_v8  ;;  %v2790_v8 = vld [vmem:[#allocation38_spill] sm:$0xff] }
 0x223   :  { %1025 = vmatpush.msrb.mxu1 %v2384_v1  ;;  %1069 = vmatpush.msrb.mxu2 %v2410_v10 }
 0x225   :  { %1026 = vmatpush.msrb.mxu1 %v2396_v5 }
 0x227   :  { %1027 = vmatpush.msrb.mxu1 %v2408_v9 }
 0x282   :  { %v643_v16 = vpop.f32.mrf.mxu0  ;;  %v685_v14 = vpop.f32.mrf.mxu1 }
 0x283   :  { %v646_v17 = vadd.f32 %v643_v16, %v609_v12  ;;  %v688_v18 = vadd.f32 %v685_v14, %v651_v13  ;;  %v693_v12 = vld [vmem:[#allocation4 + $0x70] sm:$0xff]  ;;  %v732_v13 = vld [vmem:[#allocation4 + $0x78] sm:$0xff] }
 0x285   :  { %v647_v11 = vmul.f32 0.5, %v646_v17  ;;  %v689_v61 = vmul.f32 0.5, %v688_v18 }
 0x287   :  { %1573 = vtanh.f32 %v647_v11 }
 0x288   :  { %1575 = vtanh.f32 %v689_v61 }
 0x289   :  { %v727_v14 = vpop.f32.mrf.mxu2  ;;  %v766_v16 = vpop.f32.mrf.mxu3 }
 0x28a   :  { %v730_v17 = vadd.f32 %v727_v14, %v693_v12  ;;  %v769_v18 = vadd.f32 %v766_v16, %v732_v13 }
 0x28c   :  { %1577 = vtanh.f32 %v730_v17  ;;  %v770_v61 = vmul.f32 0.5, %v769_v18 }
 0x28d   :  { %v1574_v11 = vpop.eup %1573 }
 0x28e   :  { %v1576_v12 = vpop.eup %1575  ;;  %v649_v13 = vmul.f32 0.5, %v1574_v11  ;;  %1579 = vtanh.f32 %v770_v61 }
 0x28f   :  { %v691_v14 = vmul.f32 0.5, %v1576_v12 }
 0x290   :  { %v650_v16 = vadd.f32 0.5, %v649_v13 }
 0x291   :  { %v692_v17 = vadd.f32 0.5, %v691_v14 }
 0x292   :  { %v1578_v18 = vpop.eup %1577 }
 0x293   :  { %v774_v61 = vmul.f32 %v692_v17, %v2259_v15  ;;  %v775_v11 = vmul.f32 %v1578_v18, %v650_v16  ;;  %v2784_v16 = vld [vmem:[#allocation32_spill] sm:$0xff]  ;;  %v2785_v18 = vld [vmem:[#allocation33_spill] sm:$0xff] }
 0x294   :  { %v1580_v12 = vpop.eup %1579  ;;  %1108 = vmatpush.msrb.mxu3 %v2784_v16  ;;  %986 = vmatpush.msrb.mxu0 %v2785_v18  ;;  %v2792_v18 = vld [vmem:[#allocation21_spill] sm:$0xff] }
 0x295   :  { %v2483_v13 = vadd.f32 %v775_v11, %v774_v61  ;;  %v772_v15 = vmul.f32 0.5, %v1580_v12  ;;  %v2786_v61 = vld [vmem:[#allocation34_spill] sm:$0xff]  ;;  %v2787_v12 = vld [vmem:[#allocation39_spill] sm:$0xff] }
 0x296   :  { %1028 = vmatpush.msrb.mxu1 %v2786_v61  ;;  %1070 = vmatpush.msrb.mxu2 %v2787_v12 }
 0x297   :  { %2783 = vst [vmem:[#allocation42_spill] sm:$0xff] %v2483_v13  ;;  %1581 = vtanh.f32 %v2483_v13  ;;  %v773_v14 = vadd.f32 0.5, %v772_v15  ;;  %v2788_v13 = vld [vmem:[#allocation36_spill] sm:$0xff]  ;;  %987 = vmatpush.msrb.mxu0 %v2789_v7  ;;  %v2791_v15 = vld [vmem:[#allocation41_spill] sm:$0xff] }
 0x298   :  { %1109 = vmatpush.msrb.mxu3 %v2788_v13  ;;  %1029 = vmatpush.msrb.mxu1 %v2790_v8 }
 0x299   :  { %1071 = vmatpush.msrb.mxu2 %v2434_v19 }
 0x29a   :  { %1110 = vmatpush.msrb.mxu3 %v2791_v15 }
 0x29d   :  { %v1582_v17 = vpop.eup %1581 }
 0x29e   :  { %v778_v11 = vmul.f32 %v1582_v17, %v773_v14  ;;  %v2793_v14 = vld [vmem:[#allocation28_spill] sm:$0xff]  ;;  %v2794_v17 = vld [vmem:[#allocation29_spill] sm:$0xff] }
 0x2a0   :  { %780 = vst [vmem:[#allocation12 + $0x18] sm:$0xff] %v778_v11  ;;  %815 = vmatmul.f32.vlgmr.msra.gmra.mxu0 %v778_v11  ;;  %857 = vmatmul.f32.vlgmr.msra.gmra.mxu1 %v778_v11 }
 0x2a1   :  { %899 = vmatmul.f32.vlgmr.msra.gmra.mxu2 %v778_v11  ;;  %938 = vmatmul.f32.vlgmr.msra.gmra.mxu3 %v778_v11  ;;  %v2795_v11 = vld [vmem:[#allocation33_spill] sm:$0xff] }
 0x2a2   :  { %1145 = vmatpush.msra.mxu0 %v2792_v18  ;;  %1187 = vmatpush.msra.mxu1 %v2249_v51 }
 0x2a3   :  { %1229 = vmatpush.msra.mxu2 %v2251_v52  ;;  %1268 = vmatpush.msra.mxu3 %v2255_v49 }
 0x2a4   :  { %1146 = vmatpush.msra.mxu0 %v2262_v20  ;;  %1188 = vmatpush.msra.mxu1 %v2264_v21 }
 0x2a5   :  { %1230 = vmatpush.msra.mxu2 %v2266_v22  ;;  %1269 = vmatpush.msra.mxu3 %v2270_v23 }
 0x2a6   :  { %1147 = vmatpush.msra.mxu0 %v2274_v24  ;;  %1189 = vmatpush.msra.mxu1 %v2276_v25 }
 0x2a7   :  { %1231 = vmatpush.msra.mxu2 %v2278_v26  ;;  %1270 = vmatpush.msra.mxu3 %v2282_v27 }
 0x2a8   :  { %1148 = vmatpush.msra.mxu0 %v2286_v28  ;;  %1190 = vmatpush.msra.mxu1 %v2288_v29 }
 0x2a9   :  { %1232 = vmatpush.msra.mxu2 %v2290_v30  ;;  %1271 = vmatpush.msra.mxu3 %v2294_v31 }
 0x2aa   :  { %1149 = vmatpush.msra.mxu0 %v2298_v32  ;;  %1191 = vmatpush.msra.mxu1 %v2300_v33 }
 0x2ab   :  { %1233 = vmatpush.msra.mxu2 %v2302_v34  ;;  %1272 = vmatpush.msra.mxu3 %v2306_v35 }
 0x2ac   :  { %1150 = vmatpush.msra.mxu0 %v2310_v36  ;;  %1192 = vmatpush.msra.mxu1 %v2312_v37 }
 0x2ad   :  { %1234 = vmatpush.msra.mxu2 %v2314_v38  ;;  %1273 = vmatpush.msra.mxu3 %v2318_v39 }
 0x2ae   :  { %1151 = vmatpush.msra.mxu0 %v2322_v40  ;;  %1193 = vmatpush.msra.mxu1 %v2324_v41 }
 0x2af   :  { %1235 = vmatpush.msra.mxu2 %v2326_v42  ;;  %1274 = vmatpush.msra.mxu3 %v2330_v43 }
 0x2b0   :  { %1152 = vmatpush.msra.mxu0 %v2334_v44  ;;  %1194 = vmatpush.msra.mxu1 %v2336_v45 }
 0x2b1   :  { %1236 = vmatpush.msra.mxu2 %v2338_v46  ;;  %1275 = vmatpush.msra.mxu3 %v2342_v47 }
 0x2b2   :  { %1153 = vmatpush.msra.mxu0 %v2346_v50  ;;  %1195 = vmatpush.msra.mxu1 %v2348_v55 }
 0x2b3   :  { %1237 = vmatpush.msra.mxu2 %v2350_v59  ;;  %1276 = vmatpush.msra.mxu3 %v2354_v60 }
 0x2b4   :  { %1154 = vmatpush.msra.mxu0 %v2358_v53  ;;  %1196 = vmatpush.msra.mxu1 %v2360_v54 }
 0x2b5   :  { %1238 = vmatpush.msra.mxu2 %v2362_v58  ;;  %1277 = vmatpush.msra.mxu3 %v2366_v56 }
 0x2b6   :  { %1155 = vmatpush.msra.mxu0 %v2370_v48  ;;  %1197 = vmatpush.msra.mxu1 %v2372_v57 }
 0x2b7   :  { %1239 = vmatpush.msra.mxu2 %v2374_v63  ;;  %1278 = vmatpush.msra.mxu3 %v2378_v62 }
 0x2b8   :  { %1156 = vmatpush.msra.mxu0 %v2382_v0  ;;  %1198 = vmatpush.msra.mxu1 %v2384_v1 }
 0x2b9   :  { %1240 = vmatpush.msra.mxu2 %v2386_v2  ;;  %1279 = vmatpush.msra.mxu3 %v2390_v3 }
 0x2ba   :  { %1157 = vmatpush.msra.mxu0 %v2394_v4  ;;  %1199 = vmatpush.msra.mxu1 %v2396_v5  ;;  %v905_v5 = vld [vmem:[#allocation4 + $0x98] sm:$0xff] }
 0x2bb   :  { %1241 = vmatpush.msra.mxu2 %v2398_v6  ;;  %1280 = vmatpush.msra.mxu3 %v2793_v14 }
 0x2bc   :  { %1158 = vmatpush.msra.mxu0 %v2794_v17  ;;  %1200 = vmatpush.msra.mxu1 %v2408_v9  ;;  %v782_v9 = vld [vmem:[#allocation4 + $0x80] sm:$0xff] }
 0x2bd   :  { %1242 = vmatpush.msra.mxu2 %v2410_v10  ;;  %1281 = vmatpush.msra.mxu3 %v2784_v16  ;;  %v824_v10 = vld [vmem:[#allocation4 + $0x88] sm:$0xff] }
 0x2be   :  { %1159 = vmatpush.msra.mxu0 %v2795_v11  ;;  %1201 = vmatpush.msra.mxu1 %v2786_v61 }
 0x2bf   :  { %1243 = vmatpush.msra.mxu2 %v2787_v12  ;;  %1282 = vmatpush.msra.mxu3 %v2788_v13  ;;  %v866_v12 = vld [vmem:[#allocation4 + $0x90] sm:$0xff] }
 0x2c0   :  { %1160 = vmatpush.msra.mxu0 %v2789_v7  ;;  %1202 = vmatpush.msra.mxu1 %v2790_v8 }
 0x2c1   :  { %1244 = vmatpush.msra.mxu2 %v2434_v19  ;;  %1283 = vmatpush.msra.mxu3 %v2791_v15 }
 0x31d   :  { %v816_v17 = vpop.f32.mrf.mxu0  ;;  %v858_v16 = vpop.f32.mrf.mxu1 }
 0x31e   :  { %v819_v14 = vadd.f32 %v816_v17, %v782_v9  ;;  %v861_v11 = vadd.f32 %v858_v16, %v824_v10  ;;  %v2796_v16 = vld [vmem:[#allocation42_spill] sm:$0xff] }
 0x320   :  { %v820_v6 = vmul.f32 0.5, %v819_v14  ;;  %v862_v61 = vmul.f32 0.5, %v861_v11 }
 0x322   :  { %1583 = vtanh.f32 %v820_v6 }
 0x323   :  { %1585 = vtanh.f32 %v862_v61  ;;  %v1128_v61 = vld [vmem:[#allocation4 + $0xc0] sm:$0xff] }
 0x324   :  { %v900_v13 = vpop.f32.mrf.mxu2  ;;  %v939_v7 = vpop.f32.mrf.mxu3 }
 0x325   :  { %v903_v4 = vadd.f32 %v900_v13, %v866_v12  ;;  %v942_v8 = vadd.f32 %v939_v7, %v905_v5  ;;  %v1170_v12 = vld [vmem:[#allocation4 + $0xc8] sm:$0xff] }
 0x327   :  { %1587 = vtanh.f32 %v903_v4  ;;  %v943_v19 = vmul.f32 0.5, %v942_v8 }
 0x328   :  { %v1584_v3 = vpop.eup %1583 }
 0x329   :  { %v1586_v15 = vpop.eup %1585  ;;  %v822_v2 = vmul.f32 0.5, %v1584_v3  ;;  %1589 = vtanh.f32 %v943_v19 }
 0x32a   :  { %v864_v1 = vmul.f32 0.5, %v1586_v15 }
 0x32b   :  { %v823_v0 = vadd.f32 0.5, %v822_v2 }
 0x32c   :  { %v865_v9 = vadd.f32 0.5, %v864_v1 }
 0x32d   :  { %v1588_v10 = vpop.eup %1587 }
 0x32e   :  { %v947_v14 = vmul.f32 %v865_v9, %v2796_v16  ;;  %v948_v6 = vmul.f32 %v1588_v10, %v823_v0 }
 0x32f   :  { %v1590_v17 = vpop.eup %1589 }
 0x330   :  { %v2575_v11 = vadd.f32 %v948_v6, %v947_v14  ;;  %v945_v13 = vmul.f32 0.5, %v1590_v17  ;;  %v1212_v17 = vld [vmem:[#allocation4 + $0xd0] sm:$0xff] }
 0x332   :  { %1591 = vtanh.f32 %v2575_v11  ;;  %v946_v5 = vadd.f32 0.5, %v945_v13 }
 0x338   :  { %v1592_v4 = vpop.eup %1591 }
 0x339   :  { %v951_v7 = vmul.f32 %v1592_v4, %v946_v5 }
 0x33b   :  { %953 = vst [vmem:[#allocation12 + $0x20] sm:$0xff] %v951_v7  ;;  %988 = vmatmul.f32.vlgmr.msrb.gmra.mxu0 %v951_v7  ;;  %1030 = vmatmul.f32.vlgmr.msrb.gmra.mxu1 %v951_v7 }
 0x33c   :  { %1072 = vmatmul.f32.vlgmr.msrb.gmra.mxu2 %v951_v7  ;;  %1111 = vmatmul.f32.vlgmr.msrb.gmra.mxu3 %v951_v7 }
 0x33d   :  { %1318 = vmatpush.msrb.mxu0 %v2792_v18  ;;  %1360 = vmatpush.msrb.mxu1 %v2249_v51  ;;  %v2797_v51 = vld [vmem:[#allocation22_spill] sm:$0xff] }
 0x33e   :  { %1402 = vmatpush.msrb.mxu2 %v2251_v52  ;;  %1441 = vmatpush.msrb.mxu3 %v2255_v49  ;;  %v2798_v52 = vld [vmem:[#allocation23_spill] sm:$0xff] }
 0x33f   :  { %1319 = vmatpush.msrb.mxu0 %v2262_v20  ;;  %1361 = vmatpush.msrb.mxu1 %v2264_v21  ;;  %v2799_v49 = vld [vmem:[#allocation27_spill] sm:$0xff]  ;;  %v2800_v20 = vld [vmem:[#allocation24_spill] sm:$0xff]  ;;  %v2801_v21 = vld [vmem:[#allocation25_spill] sm:$0xff] }
 0x340   :  { %1403 = vmatpush.msrb.mxu2 %v2266_v22  ;;  %1442 = vmatpush.msrb.mxu3 %v2270_v23  ;;  %v2802_v22 = vld [vmem:[#allocation26_spill] sm:$0xff]  ;;  %v2803_v23 = vld [vmem:[#allocation31_spill] sm:$0xff] }
 0x341   :  { %1320 = vmatpush.msrb.mxu0 %v2274_v24  ;;  %1362 = vmatpush.msrb.mxu1 %v2276_v25  ;;  %v2804_v24 = vld [vmem:[#allocation28_spill] sm:$0xff]  ;;  %v2805_v25 = vld [vmem:[#allocation29_spill] sm:$0xff] }
 0x342   :  { %1404 = vmatpush.msrb.mxu2 %v2278_v26  ;;  %1443 = vmatpush.msrb.mxu3 %v2282_v27  ;;  %v2806_v26 = vld [vmem:[#allocation30_spill] sm:$0xff]  ;;  %v2807_v27 = vld [vmem:[#allocation35_spill] sm:$0xff] }
 0x343   :  { %1321 = vmatpush.msrb.mxu0 %v2286_v28  ;;  %1363 = vmatpush.msrb.mxu1 %v2288_v29  ;;  %v2808_v28 = vld [vmem:[#allocation32_spill] sm:$0xff]  ;;  %v2809_v29 = vld [vmem:[#allocation33_spill] sm:$0xff] }
 0x344   :  { %1405 = vmatpush.msrb.mxu2 %v2290_v30  ;;  %1444 = vmatpush.msrb.mxu3 %v2294_v31  ;;  %v2810_v30 = vld [vmem:[#allocation34_spill] sm:$0xff]  ;;  %v2811_v31 = vld [vmem:[#allocation39_spill] sm:$0xff] }
 0x345   :  { %1322 = vmatpush.msrb.mxu0 %v2298_v32  ;;  %1364 = vmatpush.msrb.mxu1 %v2300_v33  ;;  %v2812_v32 = vld [vmem:[#allocation36_spill] sm:$0xff]  ;;  %v2813_v33 = vld [vmem:[#allocation37_spill] sm:$0xff] }
 0x346   :  { %1406 = vmatpush.msrb.mxu2 %v2302_v34  ;;  %1445 = vmatpush.msrb.mxu3 %v2306_v35  ;;  %v2814_v34 = vld [vmem:[#allocation38_spill] sm:$0xff]  ;;  %v2815_v35 = vld [vmem:[#allocation40_spill] sm:$0xff] }
 0x347   :  { %1323 = vmatpush.msrb.mxu0 %v2310_v36  ;;  %1365 = vmatpush.msrb.mxu1 %v2312_v37  ;;  %v2816_v36 = vld [vmem:[#allocation41_spill] sm:$0xff] }
 0x348   :  { %1407 = vmatpush.msrb.mxu2 %v2314_v38  ;;  %1446 = vmatpush.msrb.mxu3 %v2318_v39  ;;  %v955_v37 = vld [vmem:[#allocation4 + $0xa0] sm:$0xff]  ;;  %v997_v38 = vld [vmem:[#allocation4 + $0xa8] sm:$0xff] }
 0x349   :  { %1324 = vmatpush.msrb.mxu0 %v2322_v40  ;;  %1366 = vmatpush.msrb.mxu1 %v2324_v41 }
 0x34a   :  { %1408 = vmatpush.msrb.mxu2 %v2326_v42  ;;  %1447 = vmatpush.msrb.mxu3 %v2330_v43 }
 0x34b   :  { %1325 = vmatpush.msrb.mxu0 %v2334_v44  ;;  %1367 = vmatpush.msrb.mxu1 %v2336_v45  ;;  %v1039_v45 = vld [vmem:[#allocation4 + $0xb0] sm:$0xff] }
 0x34c   :  { %1409 = vmatpush.msrb.mxu2 %v2338_v46  ;;  %1448 = vmatpush.msrb.mxu3 %v2342_v47  ;;  %v1078_v46 = vld [vmem:[#allocation4 + $0xb8] sm:$0xff] }
 0x34d   :  { %1326 = vmatpush.msrb.mxu0 %v2346_v50  ;;  %1368 = vmatpush.msrb.mxu1 %v2348_v55 }
 0x34e   :  { %1410 = vmatpush.msrb.mxu2 %v2350_v59  ;;  %1449 = vmatpush.msrb.mxu3 %v2354_v60 }
 0x34f   :  { %1327 = vmatpush.msrb.mxu0 %v2358_v53  ;;  %1369 = vmatpush.msrb.mxu1 %v2360_v54 }
 0x350   :  { %1411 = vmatpush.msrb.mxu2 %v2362_v58  ;;  %1450 = vmatpush.msrb.mxu3 %v2366_v56 }
 0x351   :  { %1328 = vmatpush.msrb.mxu0 %v2370_v48  ;;  %1370 = vmatpush.msrb.mxu1 %v2372_v57 }
 0x352   :  { %1412 = vmatpush.msrb.mxu2 %v2374_v63  ;;  %1451 = vmatpush.msrb.mxu3 %v2378_v62 }
 0x353   :  { %1329 = vmatpush.msrb.mxu0 %v2797_v51  ;;  %1371 = vmatpush.msrb.mxu1 %v2798_v52 }
 0x354   :  { %1413 = vmatpush.msrb.mxu2 %v2799_v49  ;;  %1452 = vmatpush.msrb.mxu3 %v2800_v20 }
 0x355   :  { %1330 = vmatpush.msrb.mxu0 %v2801_v21  ;;  %1372 = vmatpush.msrb.mxu1 %v2802_v22 }
 0x356   :  { %1414 = vmatpush.msrb.mxu2 %v2803_v23  ;;  %1453 = vmatpush.msrb.mxu3 %v2804_v24 }
 0x357   :  { %1331 = vmatpush.msrb.mxu0 %v2805_v25  ;;  %1373 = vmatpush.msrb.mxu1 %v2806_v26 }
 0x358   :  { %1415 = vmatpush.msrb.mxu2 %v2807_v27  ;;  %1454 = vmatpush.msrb.mxu3 %v2808_v28 }
 0x359   :  { %1332 = vmatpush.msrb.mxu0 %v2809_v29  ;;  %1374 = vmatpush.msrb.mxu1 %v2810_v30 }
 0x35a   :  { %1416 = vmatpush.msrb.mxu2 %v2811_v31  ;;  %1455 = vmatpush.msrb.mxu3 %v2812_v32 }
 0x35b   :  { %1333 = vmatpush.msrb.mxu0 %v2813_v33  ;;  %1375 = vmatpush.msrb.mxu1 %v2814_v34  ;;  %v1301_v33 = vld [vmem:[#allocation4 + $0xe0] sm:$0xff]  ;;  %v1343_v34 = vld [vmem:[#allocation4 + $0xe8] sm:$0xff] }
 0x35c   :  { %1417 = vmatpush.msrb.mxu2 %v2815_v35  ;;  %1456 = vmatpush.msrb.mxu3 %v2816_v36 }
 0x3b8   :  { %v989_v39 = vpop.f32.mrf.mxu0  ;;  %v1031_v40 = vpop.f32.mrf.mxu1 }
 0x3b9   :  { %v992_v41 = vadd.f32 %v989_v39, %v955_v37  ;;  %v1034_v42 = vadd.f32 %v1031_v40, %v997_v38 }
 0x3bb   :  { %v993_v43 = vmul.f32 0.5, %v992_v41  ;;  %v1035_v44 = vmul.f32 0.5, %v1034_v42  ;;  %v1385_v41 = vld [vmem:[#allocation4 + $0xf0] sm:$0xff]  ;;  %v1424_v42 = vld [vmem:[#allocation4 + $0xf8] sm:$0xff] }
 0x3bd   :  { %1593 = vtanh.f32 %v993_v43 }
 0x3be   :  { %1595 = vtanh.f32 %v1035_v44 }
 0x3bf   :  { %v1073_v47 = vpop.f32.mrf.mxu2  ;;  %v1112_v50 = vpop.f32.mrf.mxu3 }
 0x3c0   :  { %v1076_v55 = vadd.f32 %v1073_v47, %v1039_v45  ;;  %v1115_v59 = vadd.f32 %v1112_v50, %v1078_v46 }
 0x3c2   :  { %1597 = vtanh.f32 %v1076_v55  ;;  %v1116_v60 = vmul.f32 0.5, %v1115_v59 }
 0x3c3   :  { %v1594_v53 = vpop.eup %1593 }
 0x3c4   :  { %v1596_v54 = vpop.eup %1595  ;;  %v995_v58 = vmul.f32 0.5, %v1594_v53  ;;  %1599 = vtanh.f32 %v1116_v60 }
 0x3c5   :  { %v1037_v56 = vmul.f32 0.5, %v1596_v54 }
 0x3c6   :  { %v996_v48 = vadd.f32 0.5, %v995_v58 }
 0x3c7   :  { %v1038_v57 = vadd.f32 0.5, %v1037_v56 }
 0x3c8   :  { %v1598_v63 = vpop.eup %1597 }
 0x3c9   :  { %v1120_v62 = vmul.f32 %v1038_v57, %v2575_v11  ;;  %v1121_v0 = vmul.f32 %v1598_v63, %v996_v48  ;;  %v1251_v11 = vld [vmem:[#allocation4 + $0xd8] sm:$0xff] }
 0x3ca   :  { %v1600_v1 = vpop.eup %1599 }
 0x3cb   :  { %v1122_v2 = vadd.f32 %v1121_v0, %v1120_v62  ;;  %v1118_v3 = vmul.f32 0.5, %v1600_v1 }
 0x3cd   :  { %1601 = vtanh.f32 %v1122_v2  ;;  %v1119_v8 = vadd.f32 0.5, %v1118_v3 }
 0x3d3   :  { %v1602_v19 = vpop.eup %1601 }
 0x3d4   :  { %v1124_v18 = vmul.f32 %v1602_v19, %v1119_v8 }
 0x3d6   :  { %1126 = vst [vmem:[#allocation12 + $0x28] sm:$0xff] %v1124_v18  ;;  %1161 = vmatmul.f32.vlgmr.msra.gmra.mxu0 %v1124_v18  ;;  %1203 = vmatmul.f32.vlgmr.msra.gmra.mxu1 %v1124_v18 }
 0x3d7   :  { %1245 = vmatmul.f32.vlgmr.msra.gmra.mxu2 %v1124_v18  ;;  %1284 = vmatmul.f32.vlgmr.msra.gmra.mxu3 %v1124_v18 }
 0x453   :  { %v1162_v15 = vpop.f32.mrf.mxu0  ;;  %v1204_v9 = vpop.f32.mrf.mxu1 }
 0x454   :  { %v1165_v10 = vadd.f32 %v1162_v15, %v1128_v61  ;;  %v1207_v16 = vadd.f32 %v1204_v9, %v1170_v12 }
 0x456   :  { %v1166_v14 = vmul.f32 0.5, %v1165_v10  ;;  %v1208_v6 = vmul.f32 0.5, %v1207_v16 }
 0x458   :  { %1603 = vtanh.f32 %v1166_v14 }
 0x459   :  { %1605 = vtanh.f32 %v1208_v6 }
 0x45a   :  { %v1246_v13 = vpop.f32.mrf.mxu2  ;;  %v1285_v5 = vpop.f32.mrf.mxu3 }
 0x45b   :  { %v1249_v4 = vadd.f32 %v1246_v13, %v1212_v17  ;;  %v1288_v7 = vadd.f32 %v1285_v5, %v1251_v11 }
 0x45d   :  { %1607 = vtanh.f32 %v1249_v4  ;;  %v1289_v51 = vmul.f32 0.5, %v1288_v7 }
 0x45e   :  { %v1604_v52 = vpop.eup %1603 }
 0x45f   :  { %v1606_v49 = vpop.eup %1605  ;;  %v1168_v20 = vmul.f32 0.5, %v1604_v52  ;;  %1609 = vtanh.f32 %v1289_v51 }
 0x460   :  { %v1210_v21 = vmul.f32 0.5, %v1606_v49 }
 0x461   :  { %v1169_v22 = vadd.f32 0.5, %v1168_v20 }
 0x462   :  { %v1211_v23 = vadd.f32 0.5, %v1210_v21 }
 0x463   :  { %v1608_v24 = vpop.eup %1607 }
 0x464   :  { %v1293_v25 = vmul.f32 %v1211_v23, %v1122_v2  ;;  %v1294_v26 = vmul.f32 %v1608_v24, %v1169_v22 }
 0x465   :  { %v1610_v27 = vpop.eup %1609 }
 0x466   :  { %v1295_v28 = vadd.f32 %v1294_v26, %v1293_v25  ;;  %v1291_v29 = vmul.f32 0.5, %v1610_v27 }
 0x468   :  { %1611 = vtanh.f32 %v1295_v28  ;;  %v1292_v30 = vadd.f32 0.5, %v1291_v29 }
 0x46e   :  { %v1612_v31 = vpop.eup %1611 }
 0x46f   :  { %v1297_v32 = vmul.f32 %v1612_v31, %v1292_v30 }
 0x471   :  { %1299 = vst [vmem:[#allocation12 + $0x30] sm:$0xff] %v1297_v32  ;;  %1334 = vmatmul.f32.vlgmr.msrb.gmra.mxu0 %v1297_v32  ;;  %1376 = vmatmul.f32.vlgmr.msrb.gmra.mxu1 %v1297_v32 }
 0x472   :  { %1418 = vmatmul.f32.vlgmr.msrb.gmra.mxu2 %v1297_v32  ;;  %1457 = vmatmul.f32.vlgmr.msrb.gmra.mxu3 %v1297_v32 }
 0x4ee   :  { %v1335_v35 = vpop.f32.mrf.mxu0  ;;  %v1377_v36 = vpop.f32.mrf.mxu1 }
 0x4ef   :  { %v1338_v37 = vadd.f32 %v1335_v35, %v1301_v33  ;;  %v1380_v38 = vadd.f32 %v1377_v36, %v1343_v34 }
 0x4f1   :  { %v1339_v39 = vmul.f32 0.5, %v1338_v37  ;;  %v1381_v40 = vmul.f32 0.5, %v1380_v38 }
 0x4f3   :  { %1613 = vtanh.f32 %v1339_v39 }
 0x4f4   :  { %1615 = vtanh.f32 %v1381_v40 }
 0x4f5   :  { %v1419_v43 = vpop.f32.mrf.mxu2  ;;  %v1458_v44 = vpop.f32.mrf.mxu3 }
 0x4f6   :  { %v1422_v45 = vadd.f32 %v1419_v43, %v1385_v41  ;;  %v1461_v46 = vadd.f32 %v1458_v44, %v1424_v42 }
 0x4f8   :  { %1617 = vtanh.f32 %v1422_v45  ;;  %v1462_v47 = vmul.f32 0.5, %v1461_v46 }
 0x4f9   :  { %v1614_v50 = vpop.eup %1613 }
 0x4fa   :  { %v1616_v55 = vpop.eup %1615  ;;  %v1341_v59 = vmul.f32 0.5, %v1614_v50  ;;  %1619 = vtanh.f32 %v1462_v47 }
 0x4fb   :  { %v1383_v60 = vmul.f32 0.5, %v1616_v55 }
 0x4fc   :  { %v1342_v53 = vadd.f32 0.5, %v1341_v59 }
 0x4fd   :  { %v1384_v54 = vadd.f32 0.5, %v1383_v60 }
 0x4fe   :  { %v1618_v58 = vpop.eup %1617 }
 0x4ff   :  { %v1466_v56 = vmul.f32 %v1384_v54, %v1295_v28  ;;  %v1467_v48 = vmul.f32 %v1618_v58, %v1342_v53 }
 0x500   :  { %v1620_v57 = vpop.eup %1619 }
 0x501   :  { %v1468_v63 = vadd.f32 %v1467_v48, %v1466_v56  ;;  %v1464_v62 = vmul.f32 0.5, %v1620_v57 }
 0x503   :  { %1621 = vtanh.f32 %v1468_v63  ;;  %1477 = vst [vmem:[#allocation15] sm:$0xff] %v1468_v63  ;;  %v1465_v0 = vadd.f32 0.5, %v1464_v62 }
 0x509   :  { %v1622_v1 = vpop.eup %1621 }
 0x50a   :  { %v1470_v2 = vmul.f32 %v1622_v1, %v1465_v0 }
 0x50c   :  { %1472 = vst [vmem:[#allocation12 + $0x38] sm:$0xff] %v1470_v2 }
 0x50d   :  { %1476 = vst [vmem:[#allocation13] sm:$0xff] %v1470_v2  ;;  %1492 = dma.vmem_to_hbm [thread:$0]  %s1485_s3, 1024, %s1487_s19, [#allocation6], %s1810_s4, %s1810_s4, %s1811_s30  }
 0x50e   :  { %1503 = dma.vmem_to_hbm [thread:$0]  %s1499_s21, 128, %s1501_s24, [#allocation14]  }
 0x50f   :  { %1514 = dma.vmem_to_hbm [thread:$0]  %s1510_s26, 128, %s1512_s29, [#allocation14]  }
 0x510   :  { %1797 = dma.done.wait [#allocation6], 1024  }
 0x511   :  { %1798 = vsyncadd [#allocation6], 4294966272 }
 0x512   :  { %1799 = dma.done.wait [#allocation14], 256  }
 0x513   :  { %1800 = vsyncadd [#allocation14], 4294967040 }
 0x514   :  { %1527 = vsyncpa [#allocation5], 1 }
 0x515   :  { %1528 = vsyncpa [#allocation8], 1 }
 0x516   :  { %1529 = vsyncpa [#allocation11], 1 }
 0x517   :  { %1530 = vsyncpa [#allocation6], 1 }
 0x518   :  { %1531 = vsyncpa [#allocation14], 1 }

</bundles_post_ra>
